<compile_context>
chip_gen: v7x
topology: tpu7x:2x2x1
jax: 0.10.0
libtpu: 0.0.40
codegen_flags: <defaults>
</compile_context>

<pallas_src>
import functools

import jax
import jax.numpy as jnp
import numpy as np
from jax import lax
from jax.experimental import pallas as pl
from jax.experimental.pallas import tpu as pltpu


# ------------------------------------------------------------------------------------------------
# Fused kernel: one (batch_tile, time_chunk) grid step.
#   x_ref    : (Tc, bB, D)   time-major input chunk (compute dtype), streamed by BlockSpec
#   w_ih_ref : (D, 4H)       W_ih^T (compute dtype), resident
#   w_hh_ref : (H, 4H)       W_hh^T (compute dtype), resident
#   b_ref    : (1, 4H)       b_ih + b_hh (f32), resident
#   out_ref  : (bB, H)       final hidden state h_T (revisited across time chunks)
#   gx_scr   : (Tc*bB, 4H)   f32 gate pre-activations for the chunk
#   h_scr/c_scr : (bB, H)    f32 recurrent state, persists across time chunks of one batch tile
# ------------------------------------------------------------------------------------------------
def _fused_lstm_chunk_kernel(x_ref, w_ih_ref, w_hh_ref, b_ref, out_ref,
                             gx_scr, h_scr, c_scr, *, act_dtype):
    tc = pl.program_id(1)
    Tc, bB, _ = x_ref.shape
    H = h_scr.shape[-1]

    @pl.when(tc == 0)
    def _init():
        h_scr[...] = jnp.zeros_like(h_scr)
        c_scr[...] = jnp.zeros_like(c_scr)

    # --- Phase A: one big MXU matmul for the whole chunk's input projection, bias folded in. ----
    # (Tc, bB, D) -> (Tc*bB, D) is a pure relabel when bB % 8 == 0 (enforced by the wrapper).
    x2 = x_ref[...].reshape(Tc * bB, x_ref.shape[-1])
    gx_scr[...] = (jnp.dot(x2, w_ih_ref[...], preferred_element_type=jnp.float32)
                   + b_ref[...])

    # --- Phase B: Tc sequential LSTM steps out of VMEM. -----------------------------------------
    w_hh = w_hh_ref[...]

    def step(t, carry):
        h, c = carry
        row0 = pl.multiple_of(t * bB, bB)
        gates = gx_scr[pl.ds(row0, bB), :] + jnp.dot(
            h.astype(w_hh.dtype), w_hh, preferred_element_type=jnp.float32)     # (bB, 4H) f32

        # PyTorch gate order [i, f, g, o]; slices are lane-aligned when H % 128 == 0.
        ga = gates.astype(act_dtype)
        i_g = jax.nn.sigmoid(ga[:, 0 * H:1 * H]).astype(jnp.float32)
        f_g = jax.nn.sigmoid(ga[:, 1 * H:2 * H]).astype(jnp.float32)
        g_g = jnp.tanh(ga[:, 2 * H:3 * H]).astype(jnp.float32)
        o_g = jax.nn.sigmoid(ga[:, 3 * H:4 * H]).astype(jnp.float32)

        c_new = f_g * c + i_g * g_g
        h_new = o_g * jnp.tanh(c_new)
        return h_new, c_new

    h_f, c_f = lax.fori_loop(0, Tc, step, (h_scr[...], c_scr[...]), unroll=True)
    h_scr[...] = h_f
    c_scr[...] = c_f

    # VMEM-only store; Pallas writes the block back to HBM after the last time chunk.
    out_ref[...] = h_f.astype(out_ref.dtype)


def _largest_divisor(n, cap, quantum=1):
    """Largest d dividing n with d <= cap, preferring multiples of `quantum`."""
    cap = max(1, min(n, cap))
    for d in range(cap, 0, -1):
        if n % d == 0 and d % quantum == 0:
            return d
    for d in range(cap, 0, -1):
        if n % d == 0:
            return d
    return 1


def _num_tensorcores():
    try:
        return max(1, int(getattr(jax.devices()[0], "num_cores", 1)))
    except Exception:  # pragma: no cover - defensive
        return 1


def lstm_encoder_pallas(x_btd, w_ih, w_hh, b_ih, b_hh, *,
                        compute_dtype=jnp.float32,
                        act_dtype=jnp.float32,
                        batch_block=None,
                        time_block=None):
    """Single-layer unidirectional LSTM encoder; returns the embedding h_T of shape (B, H), f32.

    x_btd: (B, T, D) f32 (PyTorch batch_first layout).
    w_ih: (4H, D), w_hh: (4H, H), b_ih/b_hh: (4H,)  (PyTorch layout, gate order [i, f, g, o]).
    compute_dtype: MXU operand dtype (bf16 is valid on v5e/v6e/v7x); accumulation is always f32.
    act_dtype:     dtype for the sigmoid/tanh nonlinearities (bf16 only on v6e/v7x; f32 on v5e).
    batch_block:   rows per batch tile (multiple of 8 dividing B). On v7x use ~round_up(B//2, 8).
    time_block:    timesteps per grid step (must divide T).
    """
    B, T, D = x_btd.shape
    H = w_hh.shape[1]
    G = 4 * H

    # Parameter prep: PyTorch (4H, D)/(4H, H) -> (D, 4H)/(H, 4H); the two biases are pre-summed.
    w_ih_t = jnp.transpose(w_ih, (1, 0)).astype(compute_dtype)        # (D, 4H)
    w_hh_t = jnp.transpose(w_hh, (1, 0)).astype(compute_dtype)        # (H, 4H)
    bias = (b_ih.astype(jnp.float32) + b_hh.astype(jnp.float32)).reshape(1, G)

    # Time-major input so each (time-chunk, batch-tile) is a clean rectangular block.
    x_tm = jnp.transpose(x_btd, (1, 0, 2)).astype(compute_dtype)      # (T, B, D)

    # ---- Batch tile: multiple of 8 dividing B (or B itself); >=2 tiles when >=2 TensorCores. ----
    if batch_block is None:
        if B % 8 != 0:
            bB = B
        else:
            nc = _num_tensorcores()
            cap = 256 if nc <= 1 else min(256, max(8, (-(-B // nc) + 7) // 8 * 8))
            bB = _largest_divisor(B, cap=cap, quantum=8)
    else:
        bB = int(batch_block)
    assert B % bB == 0, (B, bB)
    assert bB == B or bB % 8 == 0, (B, bB)

    # ---- Time chunk: divides T; cap so the f32 gate scratch (Tc*bB, 4H) stays <= ~2 MiB. --------
    if time_block is None:
        rows_budget = max(1, (2 * 1024 * 1024) // (G * 4))
        cap = max(1, min(32, rows_budget // bB))
        Tc = _largest_divisor(T, cap=cap)
    else:
        Tc = int(time_block)
    assert T % Tc == 0, (T, Tc)

    kernel = functools.partial(_fused_lstm_chunk_kernel, act_dtype=act_dtype)

    h_T = pl.pallas_call(
        kernel,
        out_shape=jax.ShapeDtypeStruct((B, H), jnp.float32),
        grid=(B // bB, T // Tc),
        in_specs=[
            pl.BlockSpec((Tc, bB, D), lambda ib, tc: (tc, ib, 0)),    # streamed x chunk
            pl.BlockSpec((D, G), lambda ib, tc: (0, 0)),              # resident W_ih^T
            pl.BlockSpec((H, G), lambda ib, tc: (0, 0)),              # resident W_hh^T
            pl.BlockSpec((1, G), lambda ib, tc: (0, 0)),              # resident bias
        ],
        out_specs=pl.BlockSpec((bB, H), lambda ib, tc: (ib, 0)),      # revisited across time
        scratch_shapes=[
            pltpu.VMEM((Tc * bB, G), jnp.float32),                    # gate pre-activations
            pltpu.VMEM((bB, H), jnp.float32),                         # h state
            pltpu.VMEM((bB, H), jnp.float32),                         # c state
        ],
        compiler_params=pltpu.CompilerParams(
            dimension_semantics=("parallel", "arbitrary")),
    )(x_tm, w_ih_t, w_hh_t, bias)
    return h_T


def lstm_encoder_ref(x_btd, w_ih, w_hh, b_ih, b_hh):
    """Pure-JAX reference matching torch.nn.LSTM (single layer, unidirectional, batch_first)."""
    B, T, D = x_btd.shape
    H = w_hh.shape[1]
    h = jnp.zeros((B, H), jnp.float32)
    c = jnp.zeros((B, H), jnp.float32)
    hi = lax.Precision.HIGHEST
    for t in range(T):
        x_t = x_btd[:, t, :]
        gates = (jnp.dot(x_t, w_ih.T, precision=hi)
                 + jnp.dot(h, w_hh.T, precision=hi)
                 + b_ih + b_hh)
        i_g = jax.nn.sigmoid(gates[:, 0 * H:1 * H])
        f_g = jax.nn.sigmoid(gates[:, 1 * H:2 * H])
        g_g = jnp.tanh(gates[:, 2 * H:3 * H])
        o_g = jax.nn.sigmoid(gates[:, 3 * H:4 * H])
        c = f_g * c + i_g * g_g
        h = o_g * jnp.tanh(c)
    return h  # == h_n[-1] permuted/reshaped to (B, H)


if __name__ == "__main__":
    # Small but lane/sublane-friendly shapes: B multiple of 8, H multiple of 128.
    B, T, D, H = 16, 24, 16, 128

    key = jax.random.PRNGKey(0)
    k_x, k_wi, k_wh, k_bi, k_bh = jax.random.split(key, 5)

    bound = 1.0 / np.sqrt(H)   # PyTorch-style uniform(-1/sqrt(H), 1/sqrt(H)) init
    x = jax.random.normal(k_x, (B, T, D), dtype=jnp.float32)
    w_ih = jax.random.uniform(k_wi, (4 * H, D), minval=-bound, maxval=bound, dtype=jnp.float32)
    w_hh = jax.random.uniform(k_wh, (4 * H, H), minval=-bound, maxval=bound, dtype=jnp.float32)
    b_ih = jax.random.uniform(k_bi, (4 * H,), minval=-bound, maxval=bound, dtype=jnp.float32)
    b_hh = jax.random.uniform(k_bh, (4 * H,), minval=-bound, maxval=bound, dtype=jnp.float32)

    ref = jax.block_until_ready(lstm_encoder_ref(x, w_ih, w_hh, b_ih, b_hh))

    # f32 path with explicit small tiles: exercises multi-batch-tile + multi-time-chunk state carry.
    out_f32 = jax.block_until_ready(
        lstm_encoder_pallas(x, w_ih, w_hh, b_ih, b_hh,
                            compute_dtype=jnp.float32, act_dtype=jnp.float32,
                            batch_block=8, time_block=8))
    assert out_f32.shape == (B, H), out_f32.shape
    np.testing.assert_allclose(np.asarray(out_f32), np.asarray(ref), rtol=2e-4, atol=2e-4)

    # bf16 MXU operands + bf16 gate nonlinearities (v6e/v7x fast path): loose sanity check.
    out_bf16 = jax.block_until_ready(
        lstm_encoder_pallas(x, w_ih, w_hh, b_ih, b_hh,
                            compute_dtype=jnp.bfloat16, act_dtype=jnp.bfloat16,
                            batch_block=16))
    assert out_bf16.shape == (B, H), out_bf16.shape
    assert float(np.max(np.abs(np.asarray(out_bf16) - np.asarray(ref)))) < 0.15

    print("KERNEL_OK")
</pallas_src>

<mosaic_0001>
module attributes {stable_mosaic.version = 11 : i64} {
  func.func @_fused_lstm_chunk_kernel(%arg0: i32, %arg1: i32, %arg2: memref<8x8x16xf32, #tpu.memory_space<vmem>>, %arg3: memref<16x512xf32, #tpu.memory_space<vmem>>, %arg4: memref<128x512xf32, #tpu.memory_space<vmem>>, %arg5: memref<1x512xf32, #tpu.memory_space<vmem>>, %arg6: memref<8x128xf32, #tpu.memory_space<vmem>>, %arg7: memref<64x512xf32, #tpu.memory_space<vmem>>, %arg8: memref<8x128xf32, #tpu.memory_space<vmem>>, %arg9: memref<8x128xf32, #tpu.memory_space<vmem>>) attributes {dimension_semantics = [#tpu.dimension_semantics<parallel>, #tpu.dimension_semantics<arbitrary>], iteration_bounds = array<i64: 2, 3>, scalar_prefetch = 0 : i64, scratch_operands = 3 : i64, tpu.core_type = #tpu.core_type<tc>, window_params = [{transform_indices = @transform_0, window_bounds = array<i64: 8, 8, 16>}, {pipeline_mode = #tpu.pipeline_mode<synchronous>, transform_indices = @transform_1, window_bounds = array<i64: 16, 512>}, {pipeline_mode = #tpu.pipeline_mode<synchronous>, transform_indices = @transform_2, window_bounds = array<i64: 128, 512>}, {pipeline_mode = #tpu.pipeline_mode<synchronous>, transform_indices = @transform_3, window_bounds = array<i64: 1, 512>}, {transform_indices = @transform_4, window_bounds = array<i64: 8, 128>}]} {
    %c0_i32 = arith.constant 0 : i32
    %0 = arith.cmpi eq, %arg1, %c0_i32 : i32
    %1 = arith.extui %0 : i1 to i32
    %c0_i32_0 = arith.constant 0 : i32
    %2 = arith.cmpi ne, %1, %c0_i32_0 : i32
    scf.if %2 {
      %cst_70 = arith.constant 0.000000e+00 : f32
      %265 = vector.broadcast %cst_70 : f32 to vector<8x128xf32>
      %c0_71 = arith.constant 0 : index
      %c0_72 = arith.constant 0 : index
      %266 = vector.load %arg8[%c0_71, %c0_72] : memref<8x128xf32, #tpu.memory_space<vmem>>, vector<8x128xf32>
      tpu.vector_store %arg8[%c0_71, %c0_72], %265 {strides = array<i32>} : memref<8x128xf32, #tpu.memory_space<vmem>>, vector<8x128xf32>,
      %cst_73 = arith.constant 0.000000e+00 : f32
      %267 = vector.broadcast %cst_73 : f32 to vector<8x128xf32>
      %c0_74 = arith.constant 0 : index
      %c0_75 = arith.constant 0 : index
      %268 = vector.load %arg9[%c0_74, %c0_75] : memref<8x128xf32, #tpu.memory_space<vmem>>, vector<8x128xf32>
      tpu.vector_store %arg9[%c0_74, %c0_75], %267 {strides = array<i32>} : memref<8x128xf32, #tpu.memory_space<vmem>>, vector<8x128xf32>,
    } else {
    }
    %c0 = arith.constant 0 : index
    %c0_1 = arith.constant 0 : index
    %c0_2 = arith.constant 0 : index
    %3 = vector.load %arg2[%c0, %c0_1, %c0_2] : memref<8x8x16xf32, #tpu.memory_space<vmem>>, vector<8x8x16xf32>
    %4 = vector.shape_cast %3 : vector<8x8x16xf32> to vector<64x16xf32>
    %c0_3 = arith.constant 0 : index
    %c0_4 = arith.constant 0 : index
    %5 = vector.load %arg3[%c0_3, %c0_4] : memref<16x512xf32, #tpu.memory_space<vmem>>, vector<16x512xf32>
    %cst = arith.constant dense<0.000000e+00> : vector<64x512xf32>
    %6 = tpu.matmul %4, %5, %cst {dimension_numbers = #tpu.dot_dimension_numbers<[1], [0], [0], [1], [0, 0, 1, 1], [], []>} : vector<64x16xf32>, vector<16x512xf32>, vector<64x512xf32> -> vector<64x512xf32>
    %c0_5 = arith.constant 0 : index
    %c0_6 = arith.constant 0 : index
    %7 = vector.load %arg5[%c0_5, %c0_6] : memref<1x512xf32, #tpu.memory_space<vmem>>, vector<1x512xf32>
    %8 = vector.broadcast %7 : vector<1x512xf32> to vector<64x512xf32>
    %9 = arith.addf %6, %8 : vector<64x512xf32>
    %c0_7 = arith.constant 0 : index
    %c0_8 = arith.constant 0 : index
    %10 = vector.load %arg7[%c0_7, %c0_8] : memref<64x512xf32, #tpu.memory_space<vmem>>, vector<64x512xf32>
    tpu.vector_store %arg7[%c0_7, %c0_8], %9 {strides = array<i32>} : memref<64x512xf32, #tpu.memory_space<vmem>>, vector<64x512xf32>,
    %c0_9 = arith.constant 0 : index
    %c0_10 = arith.constant 0 : index
    %11 = vector.load %arg4[%c0_9, %c0_10] : memref<128x512xf32, #tpu.memory_space<vmem>>, vector<128x512xf32>
    %c0_11 = arith.constant 0 : index
    %c0_12 = arith.constant 0 : index
    %12 = vector.load %arg8[%c0_11, %c0_12] : memref<8x128xf32, #tpu.memory_space<vmem>>, vector<8x128xf32>
    %c0_13 = arith.constant 0 : index
    %c0_14 = arith.constant 0 : index
    %13 = vector.load %arg9[%c0_13, %c0_14] : memref<8x128xf32, #tpu.memory_space<vmem>>, vector<8x128xf32>
    %c0_i32_15 = arith.constant 0 : i32
    %c8_i32 = arith.constant 8 : i32
    %14 = arith.muli %c0_i32_15, %c8_i32 : i32
    %15 = tpu.assume_multiple %14, 8 : i32
    %16 = arith.index_cast %15 : i32 to index
    %c0_16 = arith.constant 0 : index
    %17 = vector.load %arg7[%16, %c0_16] : memref<64x512xf32, #tpu.memory_space<vmem>>, vector<8x512xf32>
    %cst_17 = arith.constant dense<0.000000e+00> : vector<8x512xf32>
    %18 = tpu.matmul %12, %11, %cst_17 {dimension_numbers = #tpu.dot_dimension_numbers<[1], [0], [0], [1], [0, 0, 1, 1], [], []>} : vector<8x128xf32>, vector<128x512xf32>, vector<8x512xf32> -> vector<8x512xf32>
    %19 = arith.addf %17, %18 : vector<8x512xf32>
    %20 = vector.extract_strided_slice %19 {offsets = [0, 0], sizes = [8, 128], strides = [1, 1]} : vector<8x512xf32> to vector<8x128xf32>
    %21 = arith.negf %20 : vector<8x128xf32>
    %22 = math.exp %21 : vector<8x128xf32>
    %cst_18 = arith.constant 1.000000e+00 : f32
    %23 = vector.broadcast %cst_18 : f32 to vector<8x128xf32>
    %24 = arith.addf %23, %22 : vector<8x128xf32>
    %25 = arith.divf %23, %24 : vector<8x128xf32>
    %26 = vector.extract_strided_slice %19 {offsets = [0, 128], sizes = [8, 128], strides = [1, 1]} : vector<8x512xf32> to vector<8x128xf32>
    %27 = arith.negf %26 : vector<8x128xf32>
    %28 = math.exp %27 : vector<8x128xf32>
    %cst_19 = arith.constant 1.000000e+00 : f32
    %29 = vector.broadcast %cst_19 : f32 to vector<8x128xf32>
    %30 = arith.addf %29, %28 : vector<8x128xf32>
    %31 = arith.divf %29, %30 : vector<8x128xf32>
    %32 = vector.extract_strided_slice %19 {offsets = [0, 256], sizes = [8, 128], strides = [1, 1]} : vector<8x512xf32> to vector<8x128xf32>
    %33 = math.tanh %32 : vector<8x128xf32>
    %34 = vector.extract_strided_slice %19 {offsets = [0, 384], sizes = [8, 128], strides = [1, 1]} : vector<8x512xf32> to vector<8x128xf32>
    %35 = arith.negf %34 : vector<8x128xf32>
    %36 = math.exp %35 : vector<8x128xf32>
    %cst_20 = arith.constant 1.000000e+00 : f32
    %37 = vector.broadcast %cst_20 : f32 to vector<8x128xf32>
    %38 = arith.addf %37, %36 : vector<8x128xf32>
    %39 = arith.divf %37, %38 : vector<8x128xf32>
    %40 = arith.mulf %31, %13 : vector<8x128xf32>
    %41 = arith.mulf %25, %33 : vector<8x128xf32>
    %42 = arith.addf %40, %41 : vector<8x128xf32>
    %43 = math.tanh %42 : vector<8x128xf32>
    %44 = arith.mulf %39, %43 : vector<8x128xf32>
    %c1_i32 = arith.constant 1 : i32
    %c8_i32_21 = arith.constant 8 : i32
    %45 = arith.muli %c1_i32, %c8_i32_21 : i32
    %46 = tpu.assume_multiple %45, 8 : i32
    %47 = arith.index_cast %46 : i32 to index
    %c0_22 = arith.constant 0 : index
    %48 = vector.load %arg7[%47, %c0_22] : memref<64x512xf32, #tpu.memory_space<vmem>>, vector<8x512xf32>
    %cst_23 = arith.constant dense<0.000000e+00> : vector<8x512xf32>
    %49 = tpu.matmul %44, %11, %cst_23 {dimension_numbers = #tpu.dot_dimension_numbers<[1], [0], [0], [1], [0, 0, 1, 1], [], []>} : vector<8x128xf32>, vector<128x512xf32>, vector<8x512xf32> -> vector<8x512xf32>
    %50 = arith.addf %48, %49 : vector<8x512xf32>
    %51 = vector.extract_strided_slice %50 {offsets = [0, 0], sizes = [8, 128], strides = [1, 1]} : vector<8x512xf32> to vector<8x128xf32>
    %52 = arith.negf %51 : vector<8x128xf32>
    %53 = math.exp %52 : vector<8x128xf32>
    %cst_24 = arith.constant 1.000000e+00 : f32
    %54 = vector.broadcast %cst_24 : f32 to vector<8x128xf32>
    %55 = arith.addf %54, %53 : vector<8x128xf32>
    %56 = arith.divf %54, %55 : vector<8x128xf32>
    %57 = vector.extract_strided_slice %50 {offsets = [0, 128], sizes = [8, 128], strides = [1, 1]} : vector<8x512xf32> to vector<8x128xf32>
    %58 = arith.negf %57 : vector<8x128xf32>
    %59 = math.exp %58 : vector<8x128xf32>
    %cst_25 = arith.constant 1.000000e+00 : f32
    %60 = vector.broadcast %cst_25 : f32 to vector<8x128xf32>
    %61 = arith.addf %60, %59 : vector<8x128xf32>
    %62 = arith.divf %60, %61 : vector<8x128xf32>
    %63 = vector.extract_strided_slice %50 {offsets = [0, 256], sizes = [8, 128], strides = [1, 1]} : vector<8x512xf32> to vector<8x128xf32>
    %64 = math.tanh %63 : vector<8x128xf32>
    %65 = vector.extract_strided_slice %50 {offsets = [0, 384], sizes = [8, 128], strides = [1, 1]} : vector<8x512xf32> to vector<8x128xf32>
    %66 = arith.negf %65 : vector<8x128xf32>
    %67 = math.exp %66 : vector<8x128xf32>
    %cst_26 = arith.constant 1.000000e+00 : f32
    %68 = vector.broadcast %cst_26 : f32 to vector<8x128xf32>
    %69 = arith.addf %68, %67 : vector<8x128xf32>
    %70 = arith.divf %68, %69 : vector<8x128xf32>
    %71 = arith.mulf %62, %42 : vector<8x128xf32>
    %72 = arith.mulf %56, %64 : vector<8x128xf32>
    %73 = arith.addf %71, %72 : vector<8x128xf32>
    %74 = math.tanh %73 : vector<8x128xf32>
    %75 = arith.mulf %70, %74 : vector<8x128xf32>
    %c2_i32 = arith.constant 2 : i32
    %c8_i32_27 = arith.constant 8 : i32
    %76 = arith.muli %c2_i32, %c8_i32_27 : i32
    %77 = tpu.assume_multiple %76, 8 : i32
    %78 = arith.index_cast %77 : i32 to index
    %c0_28 = arith.constant 0 : index
    %79 = vector.load %arg7[%78, %c0_28] : memref<64x512xf32, #tpu.memory_space<vmem>>, vector<8x512xf32>
    %cst_29 = arith.constant dense<0.000000e+00> : vector<8x512xf32>
    %80 = tpu.matmul %75, %11, %cst_29 {dimension_numbers = #tpu.dot_dimension_numbers<[1], [0], [0], [1], [0, 0, 1, 1], [], []>} : vector<8x128xf32>, vector<128x512xf32>, vector<8x512xf32> -> vector<8x512xf32>
    %81 = arith.addf %79, %80 : vector<8x512xf32>
    %82 = vector.extract_strided_slice %81 {offsets = [0, 0], sizes = [8, 128], strides = [1, 1]} : vector<8x512xf32> to vector<8x128xf32>
    %83 = arith.negf %82 : vector<8x128xf32>
    %84 = math.exp %83 : vector<8x128xf32>
    %cst_30 = arith.constant 1.000000e+00 : f32
    %85 = vector.broadcast %cst_30 : f32 to vector<8x128xf32>
    %86 = arith.addf %85, %84 : vector<8x128xf32>
    %87 = arith.divf %85, %86 : vector<8x128xf32>
    %88 = vector.extract_strided_slice %81 {offsets = [0, 128], sizes = [8, 128], strides = [1, 1]} : vector<8x512xf32> to vector<8x128xf32>
    %89 = arith.negf %88 : vector<8x128xf32>
    %90 = math.exp %89 : vector<8x128xf32>
    %cst_31 = arith.constant 1.000000e+00 : f32
    %91 = vector.broadcast %cst_31 : f32 to vector<8x128xf32>
    %92 = arith.addf %91, %90 : vector<8x128xf32>
    %93 = arith.divf %91, %92 : vector<8x128xf32>
    %94 = vector.extract_strided_slice %81 {offsets = [0, 256], sizes = [8, 128], strides = [1, 1]} : vector<8x512xf32> to vector<8x128xf32>
    %95 = math.tanh %94 : vector<8x128xf32>
    %96 = vector.extract_strided_slice %81 {offsets = [0, 384], sizes = [8, 128], strides = [1, 1]} : vector<8x512xf32> to vector<8x128xf32>
    %97 = arith.negf %96 : vector<8x128xf32>
    %98 = math.exp %97 : vector<8x128xf32>
    %cst_32 = arith.constant 1.000000e+00 : f32
    %99 = vector.broadcast %cst_32 : f32 to vector<8x128xf32>
    %100 = arith.addf %99, %98 : vector<8x128xf32>
    %101 = arith.divf %99, %100 : vector<8x128xf32>
    %102 = arith.mulf %93, %73 : vector<8x128xf32>
    %103 = arith.mulf %87, %95 : vector<8x128xf32>
    %104 = arith.addf %102, %103 : vector<8x128xf32>
    %105 = math.tanh %104 : vector<8x128xf32>
    %106 = arith.mulf %101, %105 : vector<8x128xf32>
    %c3_i32 = arith.constant 3 : i32
    %c8_i32_33 = arith.constant 8 : i32
    %107 = arith.muli %c3_i32, %c8_i32_33 : i32
    %108 = tpu.assume_multiple %107, 8 : i32
    %109 = arith.index_cast %108 : i32 to index
    %c0_34 = arith.constant 0 : index
    %110 = vector.load %arg7[%109, %c0_34] : memref<64x512xf32, #tpu.memory_space<vmem>>, vector<8x512xf32>
    %cst_35 = arith.constant dense<0.000000e+00> : vector<8x512xf32>
    %111 = tpu.matmul %106, %11, %cst_35 {dimension_numbers = #tpu.dot_dimension_numbers<[1], [0], [0], [1], [0, 0, 1, 1], [], []>} : vector<8x128xf32>, vector<128x512xf32>, vector<8x512xf32> -> vector<8x512xf32>
    %112 = arith.addf %110, %111 : vector<8x512xf32>
    %113 = vector.extract_strided_slice %112 {offsets = [0, 0], sizes = [8, 128], strides = [1, 1]} : vector<8x512xf32> to vector<8x128xf32>
    %114 = arith.negf %113 : vector<8x128xf32>
    %115 = math.exp %114 : vector<8x128xf32>
    %cst_36 = arith.constant 1.000000e+00 : f32
    %116 = vector.broadcast %cst_36 : f32 to vector<8x128xf32>
    %117 = arith.addf %116, %115 : vector<8x128xf32>
    %118 = arith.divf %116, %117 : vector<8x128xf32>
    %119 = vector.extract_strided_slice %112 {offsets = [0, 128], sizes = [8, 128], strides = [1, 1]} : vector<8x512xf32> to vector<8x128xf32>
    %120 = arith.negf %119 : vector<8x128xf32>
    %121 = math.exp %120 : vector<8x128xf32>
    %cst_37 = arith.constant 1.000000e+00 : f32
    %122 = vector.broadcast %cst_37 : f32 to vector<8x128xf32>
    %123 = arith.addf %122, %121 : vector<8x128xf32>
    %124 = arith.divf %122, %123 : vector<8x128xf32>
    %125 = vector.extract_strided_slice %112 {offsets = [0, 256], sizes = [8, 128], strides = [1, 1]} : vector<8x512xf32> to vector<8x128xf32>
    %126 = math.tanh %125 : vector<8x128xf32>
    %127 = vector.extract_strided_slice %112 {offsets = [0, 384], sizes = [8, 128], strides = [1, 1]} : vector<8x512xf32> to vector<8x128xf32>
    %128 = arith.negf %127 : vector<8x128xf32>
    %129 = math.exp %128 : vector<8x128xf32>
    %cst_38 = arith.constant 1.000000e+00 : f32
    %130 = vector.broadcast %cst_38 : f32 to vector<8x128xf32>
    %131 = arith.addf %130, %129 : vector<8x128xf32>
    %132 = arith.divf %130, %131 : vector<8x128xf32>
    %133 = arith.mulf %124, %104 : vector<8x128xf32>
    %134 = arith.mulf %118, %126 : vector<8x128xf32>
    %135 = arith.addf %133, %134 : vector<8x128xf32>
    %136 = math.tanh %135 : vector<8x128xf32>
    %137 = arith.mulf %132, %136 : vector<8x128xf32>
    %c4_i32 = arith.constant 4 : i32
    %c8_i32_39 = arith.constant 8 : i32
    %138 = arith.muli %c4_i32, %c8_i32_39 : i32
    %139 = tpu.assume_multiple %138, 8 : i32
    %140 = arith.index_cast %139 : i32 to index
    %c0_40 = arith.constant 0 : index
    %141 = vector.load %arg7[%140, %c0_40] : memref<64x512xf32, #tpu.memory_space<vmem>>, vector<8x512xf32>
    %cst_41 = arith.constant dense<0.000000e+00> : vector<8x512xf32>
    %142 = tpu.matmul %137, %11, %cst_41 {dimension_numbers = #tpu.dot_dimension_numbers<[1], [0], [0], [1], [0, 0, 1, 1], [], []>} : vector<8x128xf32>, vector<128x512xf32>, vector<8x512xf32> -> vector<8x512xf32>
    %143 = arith.addf %141, %142 : vector<8x512xf32>
    %144 = vector.extract_strided_slice %143 {offsets = [0, 0], sizes = [8, 128], strides = [1, 1]} : vector<8x512xf32> to vector<8x128xf32>
    %145 = arith.negf %144 : vector<8x128xf32>
    %146 = math.exp %145 : vector<8x128xf32>
    %cst_42 = arith.constant 1.000000e+00 : f32
    %147 = vector.broadcast %cst_42 : f32 to vector<8x128xf32>
    %148 = arith.addf %147, %146 : vector<8x128xf32>
    %149 = arith.divf %147, %148 : vector<8x128xf32>
    %150 = vector.extract_strided_slice %143 {offsets = [0, 128], sizes = [8, 128], strides = [1, 1]} : vector<8x512xf32> to vector<8x128xf32>
    %151 = arith.negf %150 : vector<8x128xf32>
    %152 = math.exp %151 : vector<8x128xf32>
    %cst_43 = arith.constant 1.000000e+00 : f32
    %153 = vector.broadcast %cst_43 : f32 to vector<8x128xf32>
    %154 = arith.addf %153, %152 : vector<8x128xf32>
    %155 = arith.divf %153, %154 : vector<8x128xf32>
    %156 = vector.extract_strided_slice %143 {offsets = [0, 256], sizes = [8, 128], strides = [1, 1]} : vector<8x512xf32> to vector<8x128xf32>
    %157 = math.tanh %156 : vector<8x128xf32>
    %158 = vector.extract_strided_slice %143 {offsets = [0, 384], sizes = [8, 128], strides = [1, 1]} : vector<8x512xf32> to vector<8x128xf32>
    %159 = arith.negf %158 : vector<8x128xf32>
    %160 = math.exp %159 : vector<8x128xf32>
    %cst_44 = arith.constant 1.000000e+00 : f32
    %161 = vector.broadcast %cst_44 : f32 to vector<8x128xf32>
    %162 = arith.addf %161, %160 : vector<8x128xf32>
    %163 = arith.divf %161, %162 : vector<8x128xf32>
    %164 = arith.mulf %155, %135 : vector<8x128xf32>
    %165 = arith.mulf %149, %157 : vector<8x128xf32>
    %166 = arith.addf %164, %165 : vector<8x128xf32>
    %167 = math.tanh %166 : vector<8x128xf32>
    %168 = arith.mulf %163, %167 : vector<8x128xf32>
    %c5_i32 = arith.constant 5 : i32
    %c8_i32_45 = arith.constant 8 : i32
    %169 = arith.muli %c5_i32, %c8_i32_45 : i32
    %170 = tpu.assume_multiple %169, 8 : i32
    %171 = arith.index_cast %170 : i32 to index
    %c0_46 = arith.constant 0 : index
    %172 = vector.load %arg7[%171, %c0_46] : memref<64x512xf32, #tpu.memory_space<vmem>>, vector<8x512xf32>
    %cst_47 = arith.constant dense<0.000000e+00> : vector<8x512xf32>
    %173 = tpu.matmul %168, %11, %cst_47 {dimension_numbers = #tpu.dot_dimension_numbers<[1], [0], [0], [1], [0, 0, 1, 1], [], []>} : vector<8x128xf32>, vector<128x512xf32>, vector<8x512xf32> -> vector<8x512xf32>
    %174 = arith.addf %172, %173 : vector<8x512xf32>
    %175 = vector.extract_strided_slice %174 {offsets = [0, 0], sizes = [8, 128], strides = [1, 1]} : vector<8x512xf32> to vector<8x128xf32>
    %176 = arith.negf %175 : vector<8x128xf32>
    %177 = math.exp %176 : vector<8x128xf32>
    %cst_48 = arith.constant 1.000000e+00 : f32
    %178 = vector.broadcast %cst_48 : f32 to vector<8x128xf32>
    %179 = arith.addf %178, %177 : vector<8x128xf32>
    %180 = arith.divf %178, %179 : vector<8x128xf32>
    %181 = vector.extract_strided_slice %174 {offsets = [0, 128], sizes = [8, 128], strides = [1, 1]} : vector<8x512xf32> to vector<8x128xf32>
    %182 = arith.negf %181 : vector<8x128xf32>
    %183 = math.exp %182 : vector<8x128xf32>
    %cst_49 = arith.constant 1.000000e+00 : f32
    %184 = vector.broadcast %cst_49 : f32 to vector<8x128xf32>
    %185 = arith.addf %184, %183 : vector<8x128xf32>
    %186 = arith.divf %184, %185 : vector<8x128xf32>
    %187 = vector.extract_strided_slice %174 {offsets = [0, 256], sizes = [8, 128], strides = [1, 1]} : vector<8x512xf32> to vector<8x128xf32>
    %188 = math.tanh %187 : vector<8x128xf32>
    %189 = vector.extract_strided_slice %174 {offsets = [0, 384], sizes = [8, 128], strides = [1, 1]} : vector<8x512xf32> to vector<8x128xf32>
    %190 = arith.negf %189 : vector<8x128xf32>
    %191 = math.exp %190 : vector<8x128xf32>
    %cst_50 = arith.constant 1.000000e+00 : f32
    %192 = vector.broadcast %cst_50 : f32 to vector<8x128xf32>
    %193 = arith.addf %192, %191 : vector<8x128xf32>
    %194 = arith.divf %192, %193 : vector<8x128xf32>
    %195 = arith.mulf %186, %166 : vector<8x128xf32>
    %196 = arith.mulf %180, %188 : vector<8x128xf32>
    %197 = arith.addf %195, %196 : vector<8x128xf32>
    %198 = math.tanh %197 : vector<8x128xf32>
    %199 = arith.mulf %194, %198 : vector<8x128xf32>
    %c6_i32 = arith.constant 6 : i32
    %c8_i32_51 = arith.constant 8 : i32
    %200 = arith.muli %c6_i32, %c8_i32_51 : i32
    %201 = tpu.assume_multiple %200, 8 : i32
    %202 = arith.index_cast %201 : i32 to index
    %c0_52 = arith.constant 0 : index
    %203 = vector.load %arg7[%202, %c0_52] : memref<64x512xf32, #tpu.memory_space<vmem>>, vector<8x512xf32>
    %cst_53 = arith.constant dense<0.000000e+00> : vector<8x512xf32>
    %204 = tpu.matmul %199, %11, %cst_53 {dimension_numbers = #tpu.dot_dimension_numbers<[1], [0], [0], [1], [0, 0, 1, 1], [], []>} : vector<8x128xf32>, vector<128x512xf32>, vector<8x512xf32> -> vector<8x512xf32>
    %205 = arith.addf %203, %204 : vector<8x512xf32>
    %206 = vector.extract_strided_slice %205 {offsets = [0, 0], sizes = [8, 128], strides = [1, 1]} : vector<8x512xf32> to vector<8x128xf32>
    %207 = arith.negf %206 : vector<8x128xf32>
    %208 = math.exp %207 : vector<8x128xf32>
    %cst_54 = arith.constant 1.000000e+00 : f32
    %209 = vector.broadcast %cst_54 : f32 to vector<8x128xf32>
    %210 = arith.addf %209, %208 : vector<8x128xf32>
    %211 = arith.divf %209, %210 : vector<8x128xf32>
    %212 = vector.extract_strided_slice %205 {offsets = [0, 128], sizes = [8, 128], strides = [1, 1]} : vector<8x512xf32> to vector<8x128xf32>
    %213 = arith.negf %212 : vector<8x128xf32>
    %214 = math.exp %213 : vector<8x128xf32>
    %cst_55 = arith.constant 1.000000e+00 : f32
    %215 = vector.broadcast %cst_55 : f32 to vector<8x128xf32>
    %216 = arith.addf %215, %214 : vector<8x128xf32>
    %217 = arith.divf %215, %216 : vector<8x128xf32>
    %218 = vector.extract_strided_slice %205 {offsets = [0, 256], sizes = [8, 128], strides = [1, 1]} : vector<8x512xf32> to vector<8x128xf32>
    %219 = math.tanh %218 : vector<8x128xf32>
    %220 = vector.extract_strided_slice %205 {offsets = [0, 384], sizes = [8, 128], strides = [1, 1]} : vector<8x512xf32> to vector<8x128xf32>
    %221 = arith.negf %220 : vector<8x128xf32>
    %222 = math.exp %221 : vector<8x128xf32>
    %cst_56 = arith.constant 1.000000e+00 : f32
    %223 = vector.broadcast %cst_56 : f32 to vector<8x128xf32>
    %224 = arith.addf %223, %222 : vector<8x128xf32>
    %225 = arith.divf %223, %224 : vector<8x128xf32>
    %226 = arith.mulf %217, %197 : vector<8x128xf32>
    %227 = arith.mulf %211, %219 : vector<8x128xf32>
    %228 = arith.addf %226, %227 : vector<8x128xf32>
    %229 = math.tanh %228 : vector<8x128xf32>
    %230 = arith.mulf %225, %229 : vector<8x128xf32>
    %c7_i32 = arith.constant 7 : i32
    %c8_i32_57 = arith.constant 8 : i32
    %231 = arith.muli %c7_i32, %c8_i32_57 : i32
    %232 = tpu.assume_multiple %231, 8 : i32
    %233 = arith.index_cast %232 : i32 to index
    %c0_58 = arith.constant 0 : index
    %234 = vector.load %arg7[%233, %c0_58] : memref<64x512xf32, #tpu.memory_space<vmem>>, vector<8x512xf32>
    %cst_59 = arith.constant dense<0.000000e+00> : vector<8x512xf32>
    %235 = tpu.matmul %230, %11, %cst_59 {dimension_numbers = #tpu.dot_dimension_numbers<[1], [0], [0], [1], [0, 0, 1, 1], [], []>} : vector<8x128xf32>, vector<128x512xf32>, vector<8x512xf32> -> vector<8x512xf32>
    %236 = arith.addf %234, %235 : vector<8x512xf32>
    %237 = vector.extract_strided_slice %236 {offsets = [0, 0], sizes = [8, 128], strides = [1, 1]} : vector<8x512xf32> to vector<8x128xf32>
    %238 = arith.negf %237 : vector<8x128xf32>
    %239 = math.exp %238 : vector<8x128xf32>
    %cst_60 = arith.constant 1.000000e+00 : f32
    %240 = vector.broadcast %cst_60 : f32 to vector<8x128xf32>
    %241 = arith.addf %240, %239 : vector<8x128xf32>
    %242 = arith.divf %240, %241 : vector<8x128xf32>
    %243 = vector.extract_strided_slice %236 {offsets = [0, 128], sizes = [8, 128], strides = [1, 1]} : vector<8x512xf32> to vector<8x128xf32>
    %244 = arith.negf %243 : vector<8x128xf32>
    %245 = math.exp %244 : vector<8x128xf32>
    %cst_61 = arith.constant 1.000000e+00 : f32
    %246 = vector.broadcast %cst_61 : f32 to vector<8x128xf32>
    %247 = arith.addf %246, %245 : vector<8x128xf32>
    %248 = arith.divf %246, %247 : vector<8x128xf32>
    %249 = vector.extract_strided_slice %236 {offsets = [0, 256], sizes = [8, 128], strides = [1, 1]} : vector<8x512xf32> to vector<8x128xf32>
    %250 = math.tanh %249 : vector<8x128xf32>
    %251 = vector.extract_strided_slice %236 {offsets = [0, 384], sizes = [8, 128], strides = [1, 1]} : vector<8x512xf32> to vector<8x128xf32>
    %252 = arith.negf %251 : vector<8x128xf32>
    %253 = math.exp %252 : vector<8x128xf32>
    %cst_62 = arith.constant 1.000000e+00 : f32
    %254 = vector.broadcast %cst_62 : f32 to vector<8x128xf32>
    %255 = arith.addf %254, %253 : vector<8x128xf32>
    %256 = arith.divf %254, %255 : vector<8x128xf32>
    %257 = arith.mulf %248, %228 : vector<8x128xf32>
    %258 = arith.mulf %242, %250 : vector<8x128xf32>
    %259 = arith.addf %257, %258 : vector<8x128xf32>
    %260 = math.tanh %259 : vector<8x128xf32>
    %261 = arith.mulf %256, %260 : vector<8x128xf32>
    %c8_i32_63 = arith.constant 8 : i32
    %c0_64 = arith.constant 0 : index
    %c0_65 = arith.constant 0 : index
    %262 = vector.load %arg8[%c0_64, %c0_65] : memref<8x128xf32, #tpu.memory_space<vmem>>, vector<8x128xf32>
    tpu.vector_store %arg8[%c0_64, %c0_65], %261 {strides = array<i32>} : memref<8x128xf32, #tpu.memory_space<vmem>>, vector<8x128xf32>,
    %c0_66 = arith.constant 0 : index
    %c0_67 = arith.constant 0 : index
    %263 = vector.load %arg9[%c0_66, %c0_67] : memref<8x128xf32, #tpu.memory_space<vmem>>, vector<8x128xf32>
    tpu.vector_store %arg9[%c0_66, %c0_67], %259 {strides = array<i32>} : memref<8x128xf32, #tpu.memory_space<vmem>>, vector<8x128xf32>,
    %c0_68 = arith.constant 0 : index
    %c0_69 = arith.constant 0 : index
    %264 = vector.load %arg6[%c0_68, %c0_69] : memref<8x128xf32, #tpu.memory_space<vmem>>, vector<8x128xf32>
    tpu.vector_store %arg6[%c0_68, %c0_69], %261 {strides = array<i32>} : memref<8x128xf32, #tpu.memory_space<vmem>>, vector<8x128xf32>,
    return
  }
  func.func @transform_0(%arg0: i32, %arg1: i32) -> (i32, i32, i32) {
    %c0_i32 = arith.constant 0 : i32
    %c0_i32_0 = arith.constant 0 : i32
    return %arg1, %arg0, %c0_i32 : i32, i32, i32
  }
  func.func @transform_1(%arg0: i32, %arg1: i32) -> (i32, i32) {
    %c0_i32 = arith.constant 0 : i32
    %c0_i32_0 = arith.constant 0 : i32
    %c0_i32_1 = arith.constant 0 : i32
    return %c0_i32, %c0_i32_0 : i32, i32
  }
  func.func @transform_2(%arg0: i32, %arg1: i32) -> (i32, i32) {
    %c0_i32 = arith.constant 0 : i32
    %c0_i32_0 = arith.constant 0 : i32
    %c0_i32_1 = arith.constant 0 : i32
    return %c0_i32, %c0_i32_0 : i32, i32
  }
  func.func @transform_3(%arg0: i32, %arg1: i32) -> (i32, i32) {
    %c0_i32 = arith.constant 0 : i32
    %c0_i32_0 = arith.constant 0 : i32
    %c0_i32_1 = arith.constant 0 : i32
    return %c0_i32, %c0_i32_0 : i32, i32
  }
  func.func @transform_4(%arg0: i32, %arg1: i32) -> (i32, i32) {
    %c0_i32 = arith.constant 0 : i32
    %c0_i32_0 = arith.constant 0 : i32
    return %arg0, %c0_i32 : i32, i32
  }
}

</mosaic_0001>

<bundles_post_ra>
// kernel: tpu_custom_call.1
= control target key start
LH: loop header
LB: loop body
LE: loop exit
PB: predicated region body
PF: predicated region fallthrough
CT: control target
= control target key end

     0   :  { %9 = vsyncpa [#allocation7], 0  ;;  %s4024_s0 = inlined_call_operand.vmem [shape: f32[24,16,16], index: 0, kind: input, shape index: {}]   ;;  %s4025_s1 = inlined_call_operand.vmem [shape: f32[16,512], index: 1, kind: input, shape index: {}]   ;;  %s4026_s2 = inlined_call_operand.vmem [shape: f32[128,512], index: 2, kind: input, shape index: {}]   ;;  %s4027_s3 = inlined_call_operand.vmem [shape: f32[1,512], index: 3, kind: input, shape index: {}]   ;;  %s4028_s4 = inlined_call_operand.hbm [shape: f32[16,128], index: 4, kind: output, shape index: {}]  }
   0x1   :  { %11 = vsyncpa [#allocation7 + $0x1], 0  ;;  %s3185_s15 = smov 0   ;;  %s3187_s16 = smov 0  }
   0x2   :  { %s3189_s17 = smov 0   ;;  %s3191_s18 = smov 0  }
   0x3   :  { %s3193_s19 = smov 0   ;;  %s3195_s20 = smov 0  }
   0x4   :  { %s3197_s21 = smov 0   ;;  %s3199_s22 = smov 0  }
   0x5   :  { %s3201_s23 = smov 0   ;;  %s3203_s24 = smov 0  }
   0x6 LB: > { %s2187_s25 = sadd.s32 4294967295, %s3155_s24   ;;  %s2188_s26 = sadd.s32 4294967294, %s3155_s24   ;;  %s3155_s24 = sphi %s3203_s24, %s17_s24   ;;  %s3151_s23 = sphi %s3201_s23, %s4044_s23   ;;  %s3147_s22 = sphi %s3199_s22, %s4043_s22   ;;  %s3143_s21 = sphi %s3197_s21, %s4042_s21   ;;  %s3139_s20 = sphi %s3195_s20, %s4041_s20   ;;  %s3135_s19 = sphi %s3193_s19, %s4040_s19   ;;  %s3131_s18 = sphi %s3191_s18, %s4039_s18   ;;  %s3127_s17 = sphi %s3189_s17, %s4038_s17   ;;  %s3123_s16 = sphi %s3187_s16, %s4037_s16   ;;  %s3119_s15 = sphi %s3185_s15, %s4036_s15  }
   0x7   : > { %s26_s27 = sadd.s32 1, %s3147_s22  ;;  %s29_s28 = sadd.s32 1, %s3151_s23 }
   0x8   : > { %p27_p0 = scmp.ge.s32.totalorder %s26_s27, 3  ;;  %s38_s29 = sadd.s32 1, %s3135_s19 }
   0x9   : > { %p45_p1 = scmp.ne.s32.totalorder %s3135_s19, %s3131_s18  ;;  %p46_p2 = scmp.eq.s32.totalorder %s3155_s24, 0 }
   0xa   : > { %s4046_s27 = smov (%p27_p0, %s26_s27), 0  ;;  %s4048_s28 = smov (!%p27_p0, %s29_s28), %s3151_s23 }
   0xb   : > { %s33_s30 = ssub.s32 %s3147_s22, %s4046_s27  ;;  %p3248_p3 = por %p46_p2, %p45_p1 }
   0xc   : > { %p31_p4 = scmp.ge.s32.totalorder %s4048_s28, 2  ;;  %s127_s6 = sadd.s32 1, %s3127_s17 }
   0xd   : > { %p137_p5 = scmp.ne.s32.totalorder %s3127_s17, %s3123_s16  ;;  %p138_p6 = scmp.eq.s32.totalorder %s2187_s25, 5 }
   0xe   : > { %s4050_s28 = smov (%p31_p4, %s4048_s28), 0  ;;  %p143_p8 = scmp.ne.s32.totalorder %s3123_s16, %s3119_s15 }
   0xf   : > { %p3257_p7 = por %p138_p6, %p137_p5  ;;  %s34_s8 = ssub.s32 %s3151_s23, %s4050_s28 }
  0x10   : > { %p144_p9 = scmp.eq.s32.totalorder %s2188_s26, 5  ;;  %s35_s9 = sor.u32 %s34_s8, %s33_s30 }
  0x11   : > { %p125_p10 = scmp.eq.s32.totalorder %s34_s8, 0  ;;  %p36_p11 = scmp.eq.s32.totalorder %s35_s9, 0 }
  0x12   : > { %p3265_p12 = por %p144_p9, %p143_p8  ;;  %p2190_p13 = scmp.ge.s32.totalorder %s3155_s24, 6 }
  0x13   : > { %s3270_s11 = scalar_select %p125_p10, %s3127_s17, %s127_s6  }
  0x14   : > { %s3273_s12 = scalar_select %p36_p11, %s3135_s19, %s38_s29  }
  0x15   : > { %169 = sbr.rel (%p2190_p13) target bundleno = 38 (0x26), region = 28 }
  0x1c   : > { %172 = sbr.rel (!%p3248_p3) target bundleno = 38 (0x26), region = 32  ;;  %s174_s13 = sand.u32 (%p3248_p3), 1, %s3135_s19  }
  0x1d   : > { %s2243_s14 = sshll.u32 (%p3248_p3), %s3147_s22, 4  ;;  %s2191_s25 = sshll.u32 (%p3248_p3), %s174_s13, 6 }
  0x1e   : > { %s179_s26 = sadd.s32 (%p3248_p3), %s3151_s23, %s2243_s14  ;;  %s176_s29 = scalar_lea.vmem (%p3248_p3), [#allocation5], %s2191_s25 }
  0x1f   : > { %s2194_s30 = sshll.u32 (%p3248_p3), %s179_s26, 3 }
  0x20   : > { %s181_s6 = scalar_lea.vmem (%p3248_p3), %s4024_s0, %s2194_s30 }
  0x21   : > { %v223_v0 = vld [vmem:[%s181_s6] sm:$0xff] (%p3248_p3)  ;;  %v225_v1 = vld [vmem:[%s181_s6 + $0x10] sm:$0xff] (%p3248_p3) }
  0x22   : > { %v227_v2 = vld [vmem:[%s181_s6 + $0x20] sm:$0xff] (%p3248_p3)  ;;  %224 = vst [vmem:[%s176_s29] sm:$0xff] (%p3248_p3), %v223_v0  ;;  %226 = vst [vmem:[%s176_s29 + $0x8] sm:$0xff] (%p3248_p3), %v225_v1  ;;  %v229_v3 = vld [vmem:[%s181_s6 + $0x30] sm:$0xff] (%p3248_p3) }
  0x23   : > { %228 = vst [vmem:[%s176_s29 + $0x10] sm:$0xff] %v227_v2  ;;  %v231_v4 = vld [vmem:[%s181_s6 + $0x40] sm:$0xff]  ;;  %v233_v5 = vld [vmem:[%s181_s6 + $0x50] sm:$0xff]  ;;  %230 = vst [vmem:[%s176_s29 + $0x18] sm:$0xff] %v229_v3 }
  0x24   : > { %232 = vst [vmem:[%s176_s29 + $0x20] sm:$0xff] %v231_v4  ;;  %234 = vst [vmem:[%s176_s29 + $0x28] sm:$0xff] %v233_v5  ;;  %v235_v6 = vld [vmem:[%s181_s6 + $0x60] sm:$0xff]  ;;  %v237_v7 = vld [vmem:[%s181_s6 + $0x70] sm:$0xff] }
  0x25   : > { %236 = vst [vmem:[%s176_s29 + $0x30] sm:$0xff] %v235_v6  ;;  %238 = vst [vmem:[%s176_s29 + $0x38] sm:$0xff] %v237_v7 }
  0x26 PF: > { %p2195_p0 = scmp.ge.s32.totalorder %s3155_s24, 1  ;;  %p243_p1 = scmp.lt.s32.totalorder %s3155_s24, 7 }
  0x28   : > { %p244_p2 = pnand %p2195_p0, %p243_p1 }
  0x29   : > { %s250_s5 = sand.u32 (!%p244_p2), 1, %s3131_s18   ;;  %s4029_s13 = sand.u32 (!%p244_p2), 1, %s3123_s16  }
  0x2a   : > { %247 = sbr.rel (%p244_p2) target bundleno = 2174 (0x87e), region = 70  ;;  %s2196_s14 = sshll.u32 (!%p244_p2), %s250_s5, 6 }
  0x2b   : > { %s3290_s25 = sshll.u32 (!%p244_p2), %s4029_s13, 3  ;;  %s3292_s26 = scalar_lea.vmem (!%p244_p2), [#allocation5], %s2196_s14 }
  0x2c   : > { %p2198_p3 = scmp.ne.s32.totalorder (!%p244_p2), %s3139_s20, 0 }
  0x31   : > { %279 = sbr.rel (%p2198_p3) target bundleno = 56 (0x38), region = 78  ;;  %v3157_v8 = vmov (!%p2198_p3), 0.0  }
  0x32   : > { %280 = vst [vmem:[#allocation3] sm:$0xff] (!%p2198_p3), %v3157_v8  ;;  %281 = vst [vmem:[#allocation4] sm:$0xff] (!%p2198_p3), %v3157_v8 }
  0x38 PF: > { %v291_v9 = vld [vmem:[%s4025_s1 + $0x8] sm:$0xff]  ;;  %v293_v11 = vld [vmem:[%s4025_s1 + $0x18] sm:$0xff]  ;;  %v290_v14 = vld [vmem:[%s4025_s1] sm:$0xff]  ;;  %v3158_v16 = vmov 0.0   ;;  %vm320_vm0 = vcmask 130048   ;;  %s2240_s5 = sshll.u32 %s3143_s21, 7 }
  0x39   : > { %v295_v10 = vld [vmem:[%s4025_s1 + $0x28] sm:$0xff]  ;;  %v297_v13 = vld [vmem:[%s4025_s1 + $0x38] sm:$0xff]  ;;  %v294_v15 = vld [vmem:[%s4025_s1 + $0x20] sm:$0xff]  ;;  %409 = vmatprep.mubr.f32.mxu0 %v3158_v16  ;;  %522 = vmatprep.mubr.f32.mxu1 %v3158_v16  ;;  %s4033_s13 = scalar_lea.vmem [#allocation6], %s3290_s25  ;;  %s3961_s8 = scalar_lea.hbm %s4028_s4, %s2240_s5 }
  0x3a   : > { %v2244_v12 = vpack.c.bf16 %v295_v10, %v291_v9  ;;  %v2248_v17 = vpack.c.bf16 %v297_v13, %v293_v11  ;;  %v2246_v18 = vpack.c.bf16 %v294_v15, %v290_v14  ;;  %v292_v19 = vld [vmem:[%s4025_s1 + $0x10] sm:$0xff]  ;;  %v604_v23 = vld [vmem:[%s4026_s2 + $0x8] sm:$0xff]  ;;  %v606_v25 = vld [vmem:[%s4026_s2 + $0x18] sm:$0xff]  ;;  %s2102_s30 = sshll.u32 %s4033_s13, 4  ;;  %s4034_s9 = smov %s4033_s13  ;;  %s3963_s30 = int_to_ptr.vmem [resolvable:$true] %s2102_s30 }
  0x3b   : > { %v296_v20 = vld [vmem:[%s4025_s1 + $0x30] sm:$0xff]  ;;  %v608_v24 = vld [vmem:[%s4026_s2 + $0x28] sm:$0xff]  ;;  %v610_v27 = vld [vmem:[%s4026_s2 + $0x38] sm:$0xff]  ;;  %s4035_s18 = sand.u32 1, %s3123_s16   ;;  %s3045_s6 = scalar_lea.vmem %s3963_s30, 128 }
  0x3c   : > { %v282_v21 = vld [vmem:[%s3292_s26] sm:$0xff]  ;;  %2245 = vmatprep.subr.bf16.mxu0 %v2244_v12  ;;  %v2250_v22 = vpack.c.bf16 %v296_v20, %v292_v19  ;;  %2249 = vmatprep.subr.bf16.mxu1 %v2248_v17  ;;  %v3332_v26 = vpack.c.bf16 %v608_v24, %v604_v23  ;;  %v603_v28 = vld [vmem:[%s4026_s2] sm:$0xff]  ;;  %v3343_v30 = vpack.c.bf16 %v610_v27, %v606_v25  ;;  %v612_v35 = vld [vmem:[%s4026_s2 + $0x48] sm:$0xff]  ;;  %s2089_s21 = scalar_lea.sflag [#allocation7], %s4035_s18  ;;  %p3046_p4 = scmp.ne.s32.totalorder %s3963_s30, %s3045_s6 }
  0x3d   : > { %2247 = vmatpush1.bf16.msra.mxu0 %v2246_v18  ;;  %v607_v29 = vld [vmem:[%s4026_s2 + $0x20] sm:$0xff]  ;;  %v605_v32 = vld [vmem:[%s4026_s2 + $0x10] sm:$0xff]  ;;  %v616_v36 = vld [vmem:[%s4026_s2 + $0x68] sm:$0xff] }
  0x3e   : > { %2251 = vmatpush1.bf16.msra.mxu1 %v2250_v22  ;;  %v3345_v31 = vpack.c.bf16 %v607_v29, %v603_v28  ;;  %v609_v33 = vld [vmem:[%s4026_s2 + $0x30] sm:$0xff]  ;;  %2253 = vmatprep.subr.bf16.mxu0 %v3332_v26  ;;  %v614_v37 = vld [vmem:[%s4026_s2 + $0x58] sm:$0xff]  ;;  %v3367_v38 = vpack.c.bf16 %v616_v36, %v612_v35  ;;  %v611_v40 = vld [vmem:[%s4026_s2 + $0x40] sm:$0xff]  ;;  %p3047_p5 = pnand %p3046_p4, %p3257_p7 }
  0x3f   : > { %v3354_v34 = vpack.c.bf16 %v609_v33, %v605_v32  ;;  %2285 = vmatprep.subr.bf16.mxu1 %v3343_v30  ;;  %v618_v39 = vld [vmem:[%s4026_s2 + $0x78] sm:$0xff]  ;;  %v615_v41 = vld [vmem:[%s4026_s2 + $0x60] sm:$0xff]  ;;  %v613_v45 = vld [vmem:[%s4026_s2 + $0x50] sm:$0xff] }
  0x40   : > { %2199 = vmatmul.mubr.msk.f32.vlgmr.msra.gmra.mrb[0].mxu0 %vm320_vm0, %v282_v21  ;;  %v283_v42 = vld [vmem:[%s3292_s26 + $0x8] sm:$0xff]  ;;  %v3381_v43 = vpack.c.bf16 %v618_v39, %v614_v37  ;;  %v3383_v44 = vpack.c.bf16 %v615_v41, %v611_v40  ;;  %v617_v46 = vld [vmem:[%s4026_s2 + $0x70] sm:$0xff]  ;;  %v620_v48 = vld [vmem:[%s4026_s2 + $0x88] sm:$0xff]  ;;  %p3048_p6 = pneg %p3047_p5 }
  0x41   : > { %2207 = vmatmul.mubr.msk.f32.vlgmr.msra.gmra.mrb[0].mxu1 %vm320_vm0, %v282_v21  ;;  %2255 = vmatpush1.bf16.msra.mxu0 %v3345_v31  ;;  %v3393_v47 = vpack.c.bf16 %v617_v46, %v613_v45  ;;  %v624_v49 = vld [vmem:[%s4026_s2 + $0xa8] sm:$0xff]  ;;  %v622_v50 = vld [vmem:[%s4026_s2 + $0x98] sm:$0xff]  ;;  %v619_v53 = vld [vmem:[%s4026_s2 + $0x80] sm:$0xff] }
  0x42   : > { %2287 = vmatpush1.bf16.msra.mxu1 %v3354_v34  ;;  %415 = vmatprep.mubr.f32.mxu0 %v3158_v16  ;;  %v3406_v51 = vpack.c.bf16 %v624_v49, %v620_v48  ;;  %v626_v52 = vld [vmem:[%s4026_s2 + $0xb8] sm:$0xff]  ;;  %v623_v54 = vld [vmem:[%s4026_s2 + $0xa0] sm:$0xff]  ;;  %v621_v57 = vld [vmem:[%s4026_s2 + $0x90] sm:$0xff] }
  0x43   : > { %528 = vmatprep.mubr.f32.mxu1 %v3158_v16  ;;  %2257 = vmatprep.subr.bf16.mxu0 %v3367_v38  ;;  %v284_v55 = vld [vmem:[%s3292_s26 + $0x10] sm:$0xff]  ;;  %v3420_v56 = vpack.c.bf16 %v626_v52, %v622_v50  ;;  %v625_v58 = vld [vmem:[%s4026_s2 + $0xb0] sm:$0xff]  ;;  %v3430_v59 = vpack.c.bf16 %v623_v54, %v619_v53  ;;  %v628_v60 = vld [vmem:[%s4026_s2 + $0xc8] sm:$0xff] }
  0x44   : > { %2200 = vmatmul.mubr.msk.f32.gmra.mrb[2].mxu0 %vm320_vm0, %v283_v42  ;;  %2289 = vmatprep.subr.bf16.mxu1 %v3381_v43  ;;  %v632_v61 = vld [vmem:[%s4026_s2 + $0xe8] sm:$0xff]  ;;  %v630_v62 = vld [vmem:[%s4026_s2 + $0xd8] sm:$0xff]  ;;  %v3443_v63 = vpack.c.bf16 %v625_v58, %v621_v57  ;;  %v627_v1 = vld [vmem:[%s4026_s2 + $0xc0] sm:$0xff] }
  0x45   : > { %2208 = vmatmul.mubr.msk.f32.gmra.mrb[2].mxu1 %vm320_vm0, %v283_v42  ;;  %2259 = vmatpush1.bf16.msra.mxu0 %v3383_v44  ;;  %v634_v0 = vld [vmem:[%s4026_s2 + $0xf8] sm:$0xff]  ;;  %v631_v2 = vld [vmem:[%s4026_s2 + $0xe0] sm:$0xff]  ;;  %v3456_v3 = vpack.c.bf16 %v632_v61, %v628_v60  ;;  %v629_v4 = vld [vmem:[%s4026_s2 + $0xd0] sm:$0xff] }
  0x46   : > { %2291 = vmatpush1.bf16.msra.mxu1 %v3393_v47  ;;  %421 = vmatprep.mubr.f32.mxu0 %v3158_v16  ;;  %v633_v5 = vld [vmem:[%s4026_s2 + $0xf0] sm:$0xff]  ;;  %v3466_v6 = vpack.c.bf16 %v634_v0, %v630_v62  ;;  %v636_v7 = vld [vmem:[%s4026_s2 + $0x108] sm:$0xff]  ;;  %v3477_v10 = vpack.c.bf16 %v631_v2, %v627_v1  ;;  %v638_v11 = vld [vmem:[%s4026_s2 + $0x118] sm:$0xff] }
  0x47   : > { %534 = vmatprep.mubr.f32.mxu1 %v3158_v16  ;;  %2261 = vmatprep.subr.bf16.mxu0 %v3406_v51  ;;  %v640_v8 = vld [vmem:[%s4026_s2 + $0x128] sm:$0xff]  ;;  %v642_v12 = vld [vmem:[%s4026_s2 + $0x138] sm:$0xff]  ;;  %v3487_v13 = vpack.c.bf16 %v633_v5, %v629_v4  ;;  %v635_v14 = vld [vmem:[%s4026_s2 + $0x100] sm:$0xff] }
  0x48   : > { %2201 = vmatmul.mubr.msk.f32.gmra.mrb[4].mxu0 %vm320_vm0, %v284_v55  ;;  %2293 = vmatprep.subr.bf16.mxu1 %v3420_v56  ;;  %v285_v9 = vld [vmem:[%s3292_s26 + $0x18] sm:$0xff]  ;;  %v639_v15 = vld [vmem:[%s4026_s2 + $0x120] sm:$0xff]  ;;  %v3497_v17 = vpack.c.bf16 %v640_v8, %v636_v7  ;;  %v637_v18 = vld [vmem:[%s4026_s2 + $0x110] sm:$0xff]  ;;  %v3507_v20 = vpack.c.bf16 %v642_v12, %v638_v11 }
  0x49   : > { %2209 = vmatmul.mubr.msk.f32.gmra.mrb[4].mxu1 %vm320_vm0, %v284_v55  ;;  %2263 = vmatpush1.bf16.msra.mxu0 %v3430_v59  ;;  %v641_v19 = vld [vmem:[%s4026_s2 + $0x130] sm:$0xff]  ;;  %v644_v21 = vld [vmem:[%s4026_s2 + $0x148] sm:$0xff]  ;;  %v3518_v24 = vpack.c.bf16 %v639_v15, %v635_v14  ;;  %v646_v25 = vld [vmem:[%s4026_s2 + $0x158] sm:$0xff] }
  0x4a   : > { %2295 = vmatpush1.bf16.msra.mxu1 %v3443_v63  ;;  %427 = vmatprep.mubr.f32.mxu0 %v3158_v16  ;;  %v648_v22 = vld [vmem:[%s4026_s2 + $0x168] sm:$0xff]  ;;  %v286_v23 = vld [vmem:[%s3292_s26 + $0x20] sm:$0xff]  ;;  %v650_v27 = vld [vmem:[%s4026_s2 + $0x178] sm:$0xff]  ;;  %v3528_v28 = vpack.c.bf16 %v641_v19, %v637_v18  ;;  %v300_v18 = vlaneseq }
  0x4b   : > { %540 = vmatprep.mubr.f32.mxu1 %v3158_v16  ;;  %2265 = vmatprep.subr.bf16.mxu0 %v3456_v3  ;;  %v643_v29 = vld [vmem:[%s4026_s2 + $0x140] sm:$0xff]  ;;  %v3538_v33 = vpack.c.bf16 %v648_v22, %v644_v21  ;;  %v645_v35 = vld [vmem:[%s4026_s2 + $0x150] sm:$0xff]  ;;  %v3548_v37 = vpack.c.bf16 %v650_v27, %v646_v25  ;;  %v652_v39 = vld [vmem:[%s4026_s2 + $0x188] sm:$0xff] }
  0x4c   : > { %2202 = vmatmul.mubr.msk.f32.gmra.mrb[6].mxu0 %vm320_vm0, %v285_v9  ;;  %2297 = vmatprep.subr.bf16.mxu1 %v3466_v6  ;;  %v647_v32 = vld [vmem:[%s4026_s2 + $0x160] sm:$0xff]  ;;  %v649_v36 = vld [vmem:[%s4026_s2 + $0x170] sm:$0xff]  ;;  %v656_v40 = vld [vmem:[%s4026_s2 + $0x1a8] sm:$0xff]  ;;  %v301_v19 = vshrl.u32 %v300_v18, 7 }
  0x4d   : > { %2210 = vmatmul.mubr.msk.f32.gmra.mrb[6].mxu1 %vm320_vm0, %v285_v9  ;;  %2267 = vmatpush1.bf16.msra.mxu0 %v3477_v10  ;;  %v287_v41 = vld [vmem:[%s3292_s26 + $0x28] sm:$0xff]  ;;  %v3559_v42 = vpack.c.bf16 %v647_v32, %v643_v29  ;;  %v3569_v48 = vpack.c.bf16 %v649_v36, %v645_v35  ;;  %v651_v49 = vld [vmem:[%s4026_s2 + $0x180] sm:$0xff]  ;;  %v3579_v52 = vpack.c.bf16 %v656_v40, %v652_v39  ;;  %v653_v53 = vld [vmem:[%s4026_s2 + $0x190] sm:$0xff] }
  0x4e   : > { %2299 = vmatpush1.bf16.msra.mxu1 %v3487_v13  ;;  %433 = vmatprep.mubr.f32.mxu0 %v3158_v16  ;;  %v654_v45 = vld [vmem:[%s4026_s2 + $0x198] sm:$0xff]  ;;  %v655_v50 = vld [vmem:[%s4026_s2 + $0x1a0] sm:$0xff]  ;;  %v657_v54 = vld [vmem:[%s4026_s2 + $0x1b0] sm:$0xff]  ;;  %v302_v21 = vsub.s32 0, %v301_v19  ;;  %v314_v32 = vsub.s32 3, %v301_v19 }
  0x4f   : > { %546 = vmatprep.mubr.f32.mxu1 %v3158_v16  ;;  %2269 = vmatprep.subr.bf16.mxu0 %v3497_v17  ;;  %v658_v46 = vld [vmem:[%s4026_s2 + $0x1b8] sm:$0xff]  ;;  %v660_v57 = vld [vmem:[%s4026_s2 + $0x1c8] sm:$0xff]  ;;  %v288_v60 = vld [vmem:[%s3292_s26 + $0x30] sm:$0xff]  ;;  %v3600_v61 = vpack.c.bf16 %v655_v50, %v651_v49  ;;  %v3610_v1 = vpack.c.bf16 %v657_v54, %v653_v53  ;;  %v310_v50 = vsub.s32 2, %v301_v19 }
  0x50   : > { %2203 = vmatmul.mubr.msk.f32.gmra.mrb[8].mxu0 %vm320_vm0, %v286_v23  ;;  %2301 = vmatprep.subr.bf16.mxu1 %v3507_v20  ;;  %v3589_v55 = vpack.c.bf16 %v658_v46, %v654_v45  ;;  %v664_v58 = vld [vmem:[%s4026_s2 + $0x1e8] sm:$0xff]  ;;  %v662_v62 = vld [vmem:[%s4026_s2 + $0x1d8] sm:$0xff]  ;;  %v659_v2 = vld [vmem:[%s4026_s2 + $0x1c0] sm:$0xff] }
  0x51   : > { %2211 = vmatmul.mubr.msk.f32.gmra.mrb[8].mxu1 %vm320_vm0, %v286_v23  ;;  %2271 = vmatpush1.bf16.msra.mxu0 %v3518_v24  ;;  %v666_v0 = vld [vmem:[%s4026_s2 + $0x1f8] sm:$0xff]  ;;  %v663_v4 = vld [vmem:[%s4026_s2 + $0x1e0] sm:$0xff]  ;;  %v3620_v5 = vpack.c.bf16 %v664_v58, %v660_v57  ;;  %v661_v7 = vld [vmem:[%s4026_s2 + $0x1d0] sm:$0xff]  ;;  %v306_v23 = vsub.s32 1, %v301_v19 }
  0x52   : > { %2303 = vmatpush1.bf16.msra.mxu1 %v3528_v28  ;;  %439 = vmatprep.mubr.f32.mxu0 %v3158_v16  ;;  %v665_v8 = vld [vmem:[%s4026_s2 + $0x1f0] sm:$0xff]  ;;  %v3630_v9 = vpack.c.bf16 %v666_v0, %v662_v62  ;;  %v289_v11 = vld [vmem:[%s3292_s26 + $0x38] sm:$0xff]  ;;  %v3635_v12 = vpack.c.bf16 %v663_v4, %v659_v2  ;;  %v667_v15 = vld [vmem:[#allocation3] sm:$0xff]  ;;  %s3159_s26 = smov [#allocation6]  }
  0x53   : > { %552 = vmatprep.mubr.f32.mxu1 %v3158_v16  ;;  %2273 = vmatprep.subr.bf16.mxu0 %v3538_v33  ;;  %v3639_v14 = vpack.c.bf16 %v665_v8, %v661_v7  ;;  %v298_v22 = vld [vmem:[%s4027_s3] sm:$0xf]  ;;  %v668_v8 = vld [vmem:[#allocation4] sm:$0xff]  ;;  %s3049_s29 = sshll.u32 %s3159_s26, 4  ;;  %s3050_s29 = int_to_ptr.vmem [resolvable:$false] %s3049_s29 }
  0x54   : > { %2204 = vmatmul.mubr.msk.f32.gmra.mrb[10].mxu0 %vm320_vm0, %v287_v41  ;;  %2305 = vmatprep.subr.bf16.mxu1 %v3548_v37  ;;  %v3689_v25 = vrot.slane %v298_v22, %v302_v21  ;;  %v3691_v27 = vrot.slane %v298_v22, %v306_v23  ;;  %v3695_v49 = vrot.slane %v298_v22, %v314_v32  ;;  %s3051_s5 = scalar_lea.vmem %s3050_s29, 256  ;;  %p3052_p8 = scmp.lt.s32.totalorder %s3963_s30, %s3050_s29 }
  0x55   : > { %2212 = vmatmul.mubr.msk.f32.gmra.mrb[10].mxu1 %vm320_vm0, %v287_v41  ;;  %2275 = vmatpush1.bf16.msra.mxu0 %v3559_v42  ;;  %v3698_v54 = vrot.slane %v298_v22, %v310_v50  ;;  %p3053_p9 = scmp.lt.s32.totalorder %s3051_s5, %s3045_s6 }
  0x56   : > { %2307 = vmatpush1.bf16.msra.mxu1 %v3569_v48  ;;  %445 = vmatprep.mubr.f32.mxu0 %v3158_v16 }
  0x57   : > { %558 = vmatprep.mubr.f32.mxu1 %v3158_v16  ;;  %2277 = vmatprep.subr.bf16.mxu0 %v3579_v52  ;;  %p3054_p10 = por %p3053_p9, %p3052_p8 }
  0x58   : > { %2205 = vmatmul.mubr.msk.f32.gmra.mrb[12].mxu0 %vm320_vm0, %v288_v60  ;;  %2309 = vmatprep.subr.bf16.mxu1 %v3589_v55 }
  0x59   : > { %2213 = vmatmul.mubr.msk.f32.gmra.mrb[12].mxu1 %vm320_vm0, %v288_v60  ;;  %2279 = vmatpush1.bf16.msra.mxu0 %v3600_v61  ;;  %p3055_p11 = pnand %p3054_p10, %p3048_p6 }
  0x5a   : > { %2311 = vmatpush1.bf16.msra.mxu1 %v3610_v1  ;;  %451 = vmatprep.mubr.f32.mxu0 %v3158_v16 }
  0x5b   : > { %564 = vmatprep.mubr.f32.mxu1 %v3158_v16  ;;  %2281 = vmatprep.subr.bf16.mxu0 %v3620_v5 }
  0x5c   : > { %2206 = vmatmul.mubr.msk.f32.gmra.mrb[14].mxu0 %vm320_vm0, %v289_v11  ;;  %2313 = vmatprep.subr.bf16.mxu1 %v3630_v9 }
  0x5d   : > { %2214 = vmatmul.mubr.msk.f32.gmra.mrb[14].mxu1 %vm320_vm0, %v289_v11  ;;  %2283 = vmatpush1.bf16.msra.mxu0 %v3635_v12 }
  0x5e   : > { %2315 = vmatpush1.bf16.msra.mxu1 %v3639_v14  ;;  %740 = vmatprep.mubr.f32.mxu0 %v3158_v16 }
  0x5f   : > { %811 = vmatprep.mubr.f32.mxu1 %v3158_v16  ;;  %2317 = vmatprep.subr.bf16.mxu0 %v3332_v26 }
  0x60   : > { %741 = vmatmul.mubr.f32.vlgmr.msra.gmra.mrb[0].mxu0 %v667_v15  ;;  %2349 = vmatprep.subr.bf16.mxu1 %v3343_v30 }
  0x61   : > { %812 = vmatmul.mubr.f32.vlgmr.msra.gmra.mrb[0].mxu1 %v667_v15  ;;  %2319 = vmatpush1.bf16.msra.mxu0 %v3345_v31 }
  0x62   : > { %2351 = vmatpush1.bf16.msra.mxu1 %v3354_v34  ;;  %2321 = vmatprep.subr.bf16.mxu0 %v3367_v38 }
  0x63   : > { %2353 = vmatprep.subr.bf16.mxu1 %v3381_v43  ;;  %917 = vmatprep.mubr.f32.mxu0 %v3158_v16 }
  0x64   : > { %988 = vmatprep.mubr.f32.mxu1 %v3158_v16 }
  0x65   : > { %2323 = vmatpush1.bf16.msra.mxu0 %v3383_v44 }
  0x66   : > { %2355 = vmatpush1.bf16.msra.mxu1 %v3393_v47  ;;  %2325 = vmatprep.subr.bf16.mxu0 %v3406_v51 }
  0x67   : > { %2357 = vmatprep.subr.bf16.mxu1 %v3420_v56 }
  0x69   : > { %2327 = vmatpush1.bf16.msra.mxu0 %v3430_v59 }
  0x6a   : > { %2359 = vmatpush1.bf16.msra.mxu1 %v3443_v63  ;;  %2329 = vmatprep.subr.bf16.mxu0 %v3456_v3 }
  0x6b   : > { %2361 = vmatprep.subr.bf16.mxu1 %v3466_v6 }
  0x6d   : > { %2331 = vmatpush1.bf16.msra.mxu0 %v3477_v10 }
  0x6e   : > { %2363 = vmatpush1.bf16.msra.mxu1 %v3487_v13  ;;  %2333 = vmatprep.subr.bf16.mxu0 %v3497_v17 }
  0x6f   : > { %2365 = vmatprep.subr.bf16.mxu1 %v3507_v20 }
  0x71   : > { %2335 = vmatpush1.bf16.msra.mxu0 %v3518_v24 }
  0x72   : > { %2367 = vmatpush1.bf16.msra.mxu1 %v3528_v28  ;;  %2337 = vmatprep.subr.bf16.mxu0 %v3538_v33 }
  0x73   : > { %2369 = vmatprep.subr.bf16.mxu1 %v3548_v37 }
  0x75   : > { %2339 = vmatpush1.bf16.msra.mxu0 %v3559_v42 }
  0x76   : > { %2371 = vmatpush1.bf16.msra.mxu1 %v3569_v48  ;;  %2341 = vmatprep.subr.bf16.mxu0 %v3579_v52 }
  0x77   : > { %2373 = vmatprep.subr.bf16.mxu1 %v3589_v55 }
  0x79   : > { %2343 = vmatpush1.bf16.msra.mxu0 %v3600_v61 }
  0x7a   : > { %2375 = vmatpush1.bf16.msra.mxu1 %v3610_v1  ;;  %2345 = vmatprep.subr.bf16.mxu0 %v3620_v5 }
  0x7b   : > { %2377 = vmatprep.subr.bf16.mxu1 %v3630_v9 }
  0x7d   : > { %2347 = vmatpush1.bf16.msra.mxu0 %v3635_v12 }
  0x7e   : > { %2379 = vmatpush1.bf16.msra.mxu1 %v3639_v14  ;;  %2381 = vmatprep.subr.bf16.mxu0 %v3332_v26 }
  0x7f   : > { %2413 = vmatprep.subr.bf16.mxu1 %v3343_v30 }
 0x133   : > { %v742_v29 = vpop.f32.mrb[0].mxu0 }
 0x134   : > { %v2764_v35 = vadd.f32 %v742_v29, %v3689_v25  ;;  %v813_v36 = vpop.f32.mrb[0].mxu1  ;;  %v744_v39 = vpop.f32.mrb[1].mxu0 }
 0x135   : > { %v2765_v40 = vadd.f32 %v744_v39, %v3691_v27  ;;  %v815_v41 = vpop.f32.mrb[1].mxu1  ;;  %v2780_v58 = vadd.f32 %v813_v36, %v3698_v54 }
 0x136   : > { %v2215_v45 = vmul.f32 -1.442695, %v2764_v35  ;;  %v2781_v53 = vadd.f32 %v815_v41, %v3695_v49 }
 0x137   : > { %v2216_v46 = vmul.f32 -1.442695, %v2765_v40 }
 0x138   : > { %2917 = vpow2.f32 %v2215_v45  ;;  %v2217_v57 = vmul.f32 -1.442695, %v2781_v53 }
 0x139   : > { %2919 = vpow2.f32 %v2216_v46 }
 0x13a   : > { %2921 = vpow2.f32 %v2217_v57 }
 0x13b   : > { %2923 = vtanh.f32 %v2780_v58 }
 0x142   : > { %v2918_v60 = vpop.eup %2917 }
 0x143   : > { %v2920_v62 = vpop.eup %2919  ;;  %v825_v0 = vadd.f32 1.0, %v2918_v60 }
 0x144   : > { %v831_v2 = vadd.f32 1.0, %v2920_v62  ;;  %v2922_v4 = vpop.eup %2921 }
 0x145   : > { %2925 = vrcp.f32 %v825_v0  ;;  %v2924_v7 = vpop.eup %2923  ;;  %v838_v19 = vadd.f32 1.0, %v2922_v4 }
 0x146   : > { %2927 = vrcp.f32 %v831_v2 }
 0x147   : > { %2929 = vrcp.f32 %v838_v19 }
 0x14f   : > { %v2926_v11 = vpop.eup %2925 }
 0x150   : > { %v2928_v15 = vpop.eup %2927  ;;  %v842_v18 = vmul.f32 %v2926_v11, %v2924_v7 }
 0x151   : > { %v841_v21 = vmul.f32 %v2928_v15, %v668_v8  ;;  %v2930_v23 = vpop.eup %2929 }
 0x153   : > { %v3701_v22 = vadd.f32 %v842_v18, %v841_v21 }
 0x155   : > { %2931 = vtanh.f32 %v3701_v22 }
 0x15f   : > { %v2932_v29 = vpop.eup %2931 }
 0x160   : > { %v845_v32 = vmul.f32 %v2932_v29, %v2930_v23 }
 0x162   : > { %918 = vmatmul.mubr.f32.vlgmr.msra.gmra.mrb[2].mxu0 %v845_v32  ;;  %989 = vmatmul.mubr.f32.vlgmr.msra.gmra.mrb[2].mxu1 %v845_v32 }
 0x163   : > { %2383 = vmatpush1.bf16.msra.mxu0 %v3345_v31  ;;  %2415 = vmatpush1.bf16.msra.mxu1 %v3354_v34 }
 0x164   : > { %2385 = vmatprep.subr.bf16.mxu0 %v3367_v38  ;;  %2417 = vmatprep.subr.bf16.mxu1 %v3381_v43 }
 0x165   : > { %1094 = vmatprep.mubr.f32.mxu0 %v3158_v16  ;;  %1165 = vmatprep.mubr.f32.mxu1 %v3158_v16 }
 0x167   : > { %2387 = vmatpush1.bf16.msra.mxu0 %v3383_v44  ;;  %2419 = vmatpush1.bf16.msra.mxu1 %v3393_v47 }
 0x168   : > { %2389 = vmatprep.subr.bf16.mxu0 %v3406_v51  ;;  %2421 = vmatprep.subr.bf16.mxu1 %v3420_v56 }
 0x16b   : > { %2391 = vmatpush1.bf16.msra.mxu0 %v3430_v59  ;;  %2423 = vmatpush1.bf16.msra.mxu1 %v3443_v63 }
 0x16c   : > { %2393 = vmatprep.subr.bf16.mxu0 %v3456_v3  ;;  %2425 = vmatprep.subr.bf16.mxu1 %v3466_v6 }
 0x16f   : > { %2395 = vmatpush1.bf16.msra.mxu0 %v3477_v10  ;;  %2427 = vmatpush1.bf16.msra.mxu1 %v3487_v13 }
 0x170   : > { %2397 = vmatprep.subr.bf16.mxu0 %v3497_v17  ;;  %2429 = vmatprep.subr.bf16.mxu1 %v3507_v20 }
 0x173   : > { %2399 = vmatpush1.bf16.msra.mxu0 %v3518_v24  ;;  %2431 = vmatpush1.bf16.msra.mxu1 %v3528_v28 }
 0x174   : > { %2401 = vmatprep.subr.bf16.mxu0 %v3538_v33  ;;  %2433 = vmatprep.subr.bf16.mxu1 %v3548_v37 }
 0x177   : > { %2403 = vmatpush1.bf16.msra.mxu0 %v3559_v42  ;;  %2435 = vmatpush1.bf16.msra.mxu1 %v3569_v48 }
 0x178   : > { %2405 = vmatprep.subr.bf16.mxu0 %v3579_v52  ;;  %2437 = vmatprep.subr.bf16.mxu1 %v3589_v55 }
 0x17b   : > { %2407 = vmatpush1.bf16.msra.mxu0 %v3600_v61  ;;  %2439 = vmatpush1.bf16.msra.mxu1 %v3610_v1 }
 0x17c   : > { %2409 = vmatprep.subr.bf16.mxu0 %v3620_v5  ;;  %2441 = vmatprep.subr.bf16.mxu1 %v3630_v9 }
 0x17f   : > { %2411 = vmatpush1.bf16.msra.mxu0 %v3635_v12  ;;  %2443 = vmatpush1.bf16.msra.mxu1 %v3639_v14 }
 0x180   : > { %2445 = vmatprep.subr.bf16.mxu0 %v3332_v26  ;;  %2477 = vmatprep.subr.bf16.mxu1 %v3343_v30 }
 0x235   : > { %v919_v35 = vpop.f32.mrb[2].mxu0  ;;  %v990_v36 = vpop.f32.mrb[2].mxu1 }
 0x236   : > { %v2766_v39 = vadd.f32 %v919_v35, %v3689_v25  ;;  %v921_v40 = vpop.f32.mrb[3].mxu0  ;;  %v992_v41 = vpop.f32.mrb[3].mxu1  ;;  %v2782_v58 = vadd.f32 %v990_v36, %v3698_v54 }
 0x237   : > { %v2767_v45 = vadd.f32 %v921_v40, %v3691_v27  ;;  %v2783_v53 = vadd.f32 %v992_v41, %v3695_v49 }
 0x238   : > { %v2218_v46 = vmul.f32 -1.442695, %v2766_v39 }
 0x239   : > { %v2219_v50 = vmul.f32 -1.442695, %v2767_v45  ;;  %v2220_v57 = vmul.f32 -1.442695, %v2783_v53 }
 0x23a   : > { %2933 = vpow2.f32 %v2218_v46 }
 0x23b   : > { %2935 = vpow2.f32 %v2219_v50 }
 0x23c   : > { %2937 = vpow2.f32 %v2220_v57 }
 0x23d   : > { %2939 = vtanh.f32 %v2782_v58 }
 0x244   : > { %v2934_v60 = vpop.eup %2933 }
 0x245   : > { %v2936_v62 = vpop.eup %2935  ;;  %v1002_v0 = vadd.f32 1.0, %v2934_v60 }
 0x246   : > { %v1008_v2 = vadd.f32 1.0, %v2936_v62  ;;  %v2938_v4 = vpop.eup %2937 }
 0x247   : > { %2941 = vrcp.f32 %v1002_v0  ;;  %v2940_v7 = vpop.eup %2939  ;;  %v1015_v18 = vadd.f32 1.0, %v2938_v4 }
 0x248   : > { %2943 = vrcp.f32 %v1008_v2 }
 0x249   : > { %2945 = vrcp.f32 %v1015_v18 }
 0x251   : > { %v2942_v8 = vpop.eup %2941 }
 0x252   : > { %v2944_v11 = vpop.eup %2943  ;;  %v1019_v15 = vmul.f32 %v2942_v8, %v2940_v7 }
 0x253   : > { %v1018_v19 = vmul.f32 %v2944_v11, %v3701_v22  ;;  %v2946_v23 = vpop.eup %2945 }
 0x255   : > { %v3743_v21 = vadd.f32 %v1019_v15, %v1018_v19 }
 0x257   : > { %2947 = vtanh.f32 %v3743_v21 }
 0x261   : > { %v2948_v29 = vpop.eup %2947 }
 0x262   : > { %v1022_v32 = vmul.f32 %v2948_v29, %v2946_v23 }
 0x264   : > { %1095 = vmatmul.mubr.f32.vlgmr.msra.gmra.mrb[4].mxu0 %v1022_v32  ;;  %1166 = vmatmul.mubr.f32.vlgmr.msra.gmra.mrb[4].mxu1 %v1022_v32 }
 0x265   : > { %2447 = vmatpush1.bf16.msra.mxu0 %v3345_v31  ;;  %2479 = vmatpush1.bf16.msra.mxu1 %v3354_v34 }
 0x266   : > { %2449 = vmatprep.subr.bf16.mxu0 %v3367_v38  ;;  %2481 = vmatprep.subr.bf16.mxu1 %v3381_v43 }
 0x267   : > { %1271 = vmatprep.mubr.f32.mxu0 %v3158_v16  ;;  %1342 = vmatprep.mubr.f32.mxu1 %v3158_v16 }
 0x269   : > { %2451 = vmatpush1.bf16.msra.mxu0 %v3383_v44  ;;  %2483 = vmatpush1.bf16.msra.mxu1 %v3393_v47 }
 0x26a   : > { %2453 = vmatprep.subr.bf16.mxu0 %v3406_v51  ;;  %2485 = vmatprep.subr.bf16.mxu1 %v3420_v56 }
 0x26d   : > { %2455 = vmatpush1.bf16.msra.mxu0 %v3430_v59  ;;  %2487 = vmatpush1.bf16.msra.mxu1 %v3443_v63 }
 0x26e   : > { %2457 = vmatprep.subr.bf16.mxu0 %v3456_v3  ;;  %2489 = vmatprep.subr.bf16.mxu1 %v3466_v6 }
 0x271   : > { %2459 = vmatpush1.bf16.msra.mxu0 %v3477_v10  ;;  %2491 = vmatpush1.bf16.msra.mxu1 %v3487_v13 }
 0x272   : > { %2461 = vmatprep.subr.bf16.mxu0 %v3497_v17  ;;  %2493 = vmatprep.subr.bf16.mxu1 %v3507_v20 }
 0x275   : > { %2463 = vmatpush1.bf16.msra.mxu0 %v3518_v24  ;;  %2495 = vmatpush1.bf16.msra.mxu1 %v3528_v28 }
 0x276   : > { %2465 = vmatprep.subr.bf16.mxu0 %v3538_v33  ;;  %2497 = vmatprep.subr.bf16.mxu1 %v3548_v37 }
 0x279   : > { %2467 = vmatpush1.bf16.msra.mxu0 %v3559_v42  ;;  %2499 = vmatpush1.bf16.msra.mxu1 %v3569_v48 }
 0x27a   : > { %2469 = vmatprep.subr.bf16.mxu0 %v3579_v52  ;;  %2501 = vmatprep.subr.bf16.mxu1 %v3589_v55 }
 0x27d   : > { %2471 = vmatpush1.bf16.msra.mxu0 %v3600_v61  ;;  %2503 = vmatpush1.bf16.msra.mxu1 %v3610_v1 }
 0x27e   : > { %2473 = vmatprep.subr.bf16.mxu0 %v3620_v5  ;;  %2505 = vmatprep.subr.bf16.mxu1 %v3630_v9 }
 0x281   : > { %2475 = vmatpush1.bf16.msra.mxu0 %v3635_v12  ;;  %2507 = vmatpush1.bf16.msra.mxu1 %v3639_v14 }
 0x282   : > { %2509 = vmatprep.subr.bf16.mxu0 %v3332_v26  ;;  %2541 = vmatprep.subr.bf16.mxu1 %v3343_v30 }
 0x337   : > { %v1096_v22 = vpop.f32.mrb[4].mxu0  ;;  %v1167_v35 = vpop.f32.mrb[4].mxu1 }
 0x338   : > { %v2768_v36 = vadd.f32 %v1096_v22, %v3689_v25  ;;  %v1098_v39 = vpop.f32.mrb[5].mxu0  ;;  %v1169_v40 = vpop.f32.mrb[5].mxu1  ;;  %v2784_v57 = vadd.f32 %v1167_v35, %v3698_v54 }
 0x339   : > { %v2769_v41 = vadd.f32 %v1098_v39, %v3691_v27  ;;  %v2785_v50 = vadd.f32 %v1169_v40, %v3695_v49 }
 0x33a   : > { %v2221_v45 = vmul.f32 -1.442695, %v2768_v36 }
 0x33b   : > { %v2222_v46 = vmul.f32 -1.442695, %v2769_v41  ;;  %v2223_v53 = vmul.f32 -1.442695, %v2785_v50 }
 0x33c   : > { %2949 = vpow2.f32 %v2221_v45 }
 0x33d   : > { %2951 = vpow2.f32 %v2222_v46 }
 0x33e   : > { %2953 = vpow2.f32 %v2223_v53 }
 0x33f   : > { %2955 = vtanh.f32 %v2784_v57 }
 0x346   : > { %v2950_v58 = vpop.eup %2949 }
 0x347   : > { %v2952_v60 = vpop.eup %2951  ;;  %v1179_v62 = vadd.f32 1.0, %v2950_v58 }
 0x348   : > { %v1185_v0 = vadd.f32 1.0, %v2952_v60  ;;  %v2954_v2 = vpop.eup %2953 }
 0x349   : > { %2957 = vrcp.f32 %v1179_v62  ;;  %v2956_v4 = vpop.eup %2955  ;;  %v1192_v15 = vadd.f32 1.0, %v2954_v2 }
 0x34a   : > { %2959 = vrcp.f32 %v1185_v0 }
 0x34b   : > { %2961 = vrcp.f32 %v1192_v15 }
 0x353   : > { %v2958_v7 = vpop.eup %2957 }
 0x354   : > { %v2960_v8 = vpop.eup %2959  ;;  %v1196_v11 = vmul.f32 %v2958_v7, %v2956_v4 }
 0x355   : > { %v1195_v18 = vmul.f32 %v2960_v8, %v3743_v21  ;;  %v2962_v23 = vpop.eup %2961 }
 0x357   : > { %v3785_v19 = vadd.f32 %v1196_v11, %v1195_v18 }
 0x359   : > { %2963 = vtanh.f32 %v3785_v19 }
 0x363   : > { %v2964_v29 = vpop.eup %2963 }
 0x364   : > { %v1199_v32 = vmul.f32 %v2964_v29, %v2962_v23 }
 0x366   : > { %1272 = vmatmul.mubr.f32.vlgmr.msra.gmra.mrb[6].mxu0 %v1199_v32  ;;  %1343 = vmatmul.mubr.f32.vlgmr.msra.gmra.mrb[6].mxu1 %v1199_v32 }
 0x367   : > { %2511 = vmatpush1.bf16.msra.mxu0 %v3345_v31  ;;  %2543 = vmatpush1.bf16.msra.mxu1 %v3354_v34 }
 0x368   : > { %2513 = vmatprep.subr.bf16.mxu0 %v3367_v38  ;;  %2545 = vmatprep.subr.bf16.mxu1 %v3381_v43 }
 0x369   : > { %1448 = vmatprep.mubr.f32.mxu0 %v3158_v16  ;;  %1519 = vmatprep.mubr.f32.mxu1 %v3158_v16 }
 0x36b   : > { %2515 = vmatpush1.bf16.msra.mxu0 %v3383_v44  ;;  %2547 = vmatpush1.bf16.msra.mxu1 %v3393_v47 }
 0x36c   : > { %2517 = vmatprep.subr.bf16.mxu0 %v3406_v51  ;;  %2549 = vmatprep.subr.bf16.mxu1 %v3420_v56 }
 0x36f   : > { %2519 = vmatpush1.bf16.msra.mxu0 %v3430_v59  ;;  %2551 = vmatpush1.bf16.msra.mxu1 %v3443_v63 }
 0x370   : > { %2521 = vmatprep.subr.bf16.mxu0 %v3456_v3  ;;  %2553 = vmatprep.subr.bf16.mxu1 %v3466_v6 }
 0x373   : > { %2523 = vmatpush1.bf16.msra.mxu0 %v3477_v10  ;;  %2555 = vmatpush1.bf16.msra.mxu1 %v3487_v13 }
 0x374   : > { %2525 = vmatprep.subr.bf16.mxu0 %v3497_v17  ;;  %2557 = vmatprep.subr.bf16.mxu1 %v3507_v20 }
 0x377   : > { %2527 = vmatpush1.bf16.msra.mxu0 %v3518_v24  ;;  %2559 = vmatpush1.bf16.msra.mxu1 %v3528_v28 }
 0x378   : > { %2529 = vmatprep.subr.bf16.mxu0 %v3538_v33  ;;  %2561 = vmatprep.subr.bf16.mxu1 %v3548_v37 }
 0x37b   : > { %2531 = vmatpush1.bf16.msra.mxu0 %v3559_v42  ;;  %2563 = vmatpush1.bf16.msra.mxu1 %v3569_v48 }
 0x37c   : > { %2533 = vmatprep.subr.bf16.mxu0 %v3579_v52  ;;  %2565 = vmatprep.subr.bf16.mxu1 %v3589_v55 }
 0x37f   : > { %2535 = vmatpush1.bf16.msra.mxu0 %v3600_v61  ;;  %2567 = vmatpush1.bf16.msra.mxu1 %v3610_v1 }
 0x380   : > { %2537 = vmatprep.subr.bf16.mxu0 %v3620_v5  ;;  %2569 = vmatprep.subr.bf16.mxu1 %v3630_v9 }
 0x383   : > { %2539 = vmatpush1.bf16.msra.mxu0 %v3635_v12  ;;  %2571 = vmatpush1.bf16.msra.mxu1 %v3639_v14 }
 0x384   : > { %2573 = vmatprep.subr.bf16.mxu0 %v3332_v26  ;;  %2605 = vmatprep.subr.bf16.mxu1 %v3343_v30 }
 0x439   : > { %v1273_v21 = vpop.f32.mrb[6].mxu0  ;;  %v1344_v22 = vpop.f32.mrb[6].mxu1 }
 0x43a   : > { %v2770_v35 = vadd.f32 %v1273_v21, %v3689_v25  ;;  %v1275_v36 = vpop.f32.mrb[7].mxu0  ;;  %v1346_v39 = vpop.f32.mrb[7].mxu1  ;;  %v2786_v53 = vadd.f32 %v1344_v22, %v3698_v54 }
 0x43b   : > { %v2771_v40 = vadd.f32 %v1275_v36, %v3691_v27  ;;  %v2787_v46 = vadd.f32 %v1346_v39, %v3695_v49 }
 0x43c   : > { %v2224_v41 = vmul.f32 -1.442695, %v2770_v35 }
 0x43d   : > { %v2225_v45 = vmul.f32 -1.442695, %v2771_v40  ;;  %v2226_v50 = vmul.f32 -1.442695, %v2787_v46 }
 0x43e   : > { %2965 = vpow2.f32 %v2224_v41 }
 0x43f   : > { %2967 = vpow2.f32 %v2225_v45 }
 0x440   : > { %2969 = vpow2.f32 %v2226_v50 }
 0x441   : > { %2971 = vtanh.f32 %v2786_v53 }
 0x448   : > { %v2966_v57 = vpop.eup %2965 }
 0x449   : > { %v2968_v58 = vpop.eup %2967  ;;  %v1356_v60 = vadd.f32 1.0, %v2966_v57 }
 0x44a   : > { %v1362_v62 = vadd.f32 1.0, %v2968_v58  ;;  %v2970_v0 = vpop.eup %2969 }
 0x44b   : > { %2973 = vrcp.f32 %v1356_v60  ;;  %v2972_v2 = vpop.eup %2971  ;;  %v1369_v11 = vadd.f32 1.0, %v2970_v0 }
 0x44c   : > { %2975 = vrcp.f32 %v1362_v62 }
 0x44d   : > { %2977 = vrcp.f32 %v1369_v11 }
 0x455   : > { %v2974_v4 = vpop.eup %2973 }
 0x456   : > { %v2976_v7 = vpop.eup %2975  ;;  %v1373_v8 = vmul.f32 %v2974_v4, %v2972_v2 }
 0x457   : > { %v1372_v15 = vmul.f32 %v2976_v7, %v3785_v19  ;;  %v2978_v23 = vpop.eup %2977 }
 0x459   : > { %v3827_v18 = vadd.f32 %v1373_v8, %v1372_v15 }
 0x45b   : > { %2979 = vtanh.f32 %v3827_v18 }
 0x465   : > { %v2980_v29 = vpop.eup %2979 }
 0x466   : > { %v1376_v32 = vmul.f32 %v2980_v29, %v2978_v23 }
 0x468   : > { %1449 = vmatmul.mubr.f32.vlgmr.msra.gmra.mrb[8].mxu0 %v1376_v32  ;;  %1520 = vmatmul.mubr.f32.vlgmr.msra.gmra.mrb[8].mxu1 %v1376_v32 }
 0x469   : > { %2575 = vmatpush1.bf16.msra.mxu0 %v3345_v31  ;;  %2607 = vmatpush1.bf16.msra.mxu1 %v3354_v34 }
 0x46a   : > { %2577 = vmatprep.subr.bf16.mxu0 %v3367_v38  ;;  %2609 = vmatprep.subr.bf16.mxu1 %v3381_v43 }
 0x46b   : > { %1625 = vmatprep.mubr.f32.mxu0 %v3158_v16  ;;  %1696 = vmatprep.mubr.f32.mxu1 %v3158_v16 }
 0x46d   : > { %2579 = vmatpush1.bf16.msra.mxu0 %v3383_v44  ;;  %2611 = vmatpush1.bf16.msra.mxu1 %v3393_v47 }
 0x46e   : > { %2581 = vmatprep.subr.bf16.mxu0 %v3406_v51  ;;  %2613 = vmatprep.subr.bf16.mxu1 %v3420_v56 }
 0x471   : > { %2583 = vmatpush1.bf16.msra.mxu0 %v3430_v59  ;;  %2615 = vmatpush1.bf16.msra.mxu1 %v3443_v63 }
 0x472   : > { %2585 = vmatprep.subr.bf16.mxu0 %v3456_v3  ;;  %2617 = vmatprep.subr.bf16.mxu1 %v3466_v6 }
 0x475   : > { %2587 = vmatpush1.bf16.msra.mxu0 %v3477_v10  ;;  %2619 = vmatpush1.bf16.msra.mxu1 %v3487_v13 }
 0x476   : > { %2589 = vmatprep.subr.bf16.mxu0 %v3497_v17  ;;  %2621 = vmatprep.subr.bf16.mxu1 %v3507_v20 }
 0x479   : > { %2591 = vmatpush1.bf16.msra.mxu0 %v3518_v24  ;;  %2623 = vmatpush1.bf16.msra.mxu1 %v3528_v28 }
 0x47a   : > { %2593 = vmatprep.subr.bf16.mxu0 %v3538_v33  ;;  %2625 = vmatprep.subr.bf16.mxu1 %v3548_v37 }
 0x47d   : > { %2595 = vmatpush1.bf16.msra.mxu0 %v3559_v42  ;;  %2627 = vmatpush1.bf16.msra.mxu1 %v3569_v48 }
 0x47e   : > { %2597 = vmatprep.subr.bf16.mxu0 %v3579_v52  ;;  %2629 = vmatprep.subr.bf16.mxu1 %v3589_v55 }
 0x481   : > { %2599 = vmatpush1.bf16.msra.mxu0 %v3600_v61  ;;  %2631 = vmatpush1.bf16.msra.mxu1 %v3610_v1 }
 0x482   : > { %2601 = vmatprep.subr.bf16.mxu0 %v3620_v5  ;;  %2633 = vmatprep.subr.bf16.mxu1 %v3630_v9 }
 0x485   : > { %2603 = vmatpush1.bf16.msra.mxu0 %v3635_v12  ;;  %2635 = vmatpush1.bf16.msra.mxu1 %v3639_v14 }
 0x486   : > { %2637 = vmatprep.subr.bf16.mxu0 %v3332_v26  ;;  %2669 = vmatprep.subr.bf16.mxu1 %v3343_v30 }
 0x53b   : > { %v1450_v19 = vpop.f32.mrb[8].mxu0  ;;  %v1521_v21 = vpop.f32.mrb[8].mxu1 }
 0x53c   : > { %v2772_v22 = vadd.f32 %v1450_v19, %v3689_v25  ;;  %v1452_v35 = vpop.f32.mrb[9].mxu0  ;;  %v1523_v36 = vpop.f32.mrb[9].mxu1  ;;  %v2788_v50 = vadd.f32 %v1521_v21, %v3698_v54 }
 0x53d   : > { %v2773_v39 = vadd.f32 %v1452_v35, %v3691_v27  ;;  %v2789_v45 = vadd.f32 %v1523_v36, %v3695_v49 }
 0x53e   : > { %v2227_v40 = vmul.f32 -1.442695, %v2772_v22 }
 0x53f   : > { %v2228_v41 = vmul.f32 -1.442695, %v2773_v39  ;;  %v2229_v46 = vmul.f32 -1.442695, %v2789_v45 }
 0x540   : > { %2981 = vpow2.f32 %v2227_v40 }
 0x541   : > { %2983 = vpow2.f32 %v2228_v41 }
 0x542   : > { %2985 = vpow2.f32 %v2229_v46 }
 0x543   : > { %2987 = vtanh.f32 %v2788_v50 }
 0x54a   : > { %v2982_v53 = vpop.eup %2981 }
 0x54b   : > { %v2984_v57 = vpop.eup %2983  ;;  %v1533_v58 = vadd.f32 1.0, %v2982_v53 }
 0x54c   : > { %v1539_v60 = vadd.f32 1.0, %v2984_v57  ;;  %v2986_v62 = vpop.eup %2985 }
 0x54d   : > { %2989 = vrcp.f32 %v1533_v58  ;;  %v2988_v0 = vpop.eup %2987  ;;  %v1546_v8 = vadd.f32 1.0, %v2986_v62 }
 0x54e   : > { %2991 = vrcp.f32 %v1539_v60 }
 0x54f   : > { %2993 = vrcp.f32 %v1546_v8 }
 0x557   : > { %v2990_v2 = vpop.eup %2989 }
 0x558   : > { %v2992_v4 = vpop.eup %2991  ;;  %v1550_v7 = vmul.f32 %v2990_v2, %v2988_v0 }
 0x559   : > { %v1549_v11 = vmul.f32 %v2992_v4, %v3827_v18  ;;  %v2994_v23 = vpop.eup %2993 }
 0x55b   : > { %v3869_v15 = vadd.f32 %v1550_v7, %v1549_v11 }
 0x55d   : > { %2995 = vtanh.f32 %v3869_v15 }
 0x567   : > { %v2996_v29 = vpop.eup %2995 }
 0x568   : > { %v1553_v32 = vmul.f32 %v2996_v29, %v2994_v23 }
 0x56a   : > { %1626 = vmatmul.mubr.f32.vlgmr.msra.gmra.mrb[10].mxu0 %v1553_v32  ;;  %1697 = vmatmul.mubr.f32.vlgmr.msra.gmra.mrb[10].mxu1 %v1553_v32 }
 0x56b   : > { %2639 = vmatpush1.bf16.msra.mxu0 %v3345_v31  ;;  %2671 = vmatpush1.bf16.msra.mxu1 %v3354_v34 }
 0x56c   : > { %2641 = vmatprep.subr.bf16.mxu0 %v3367_v38  ;;  %2673 = vmatprep.subr.bf16.mxu1 %v3381_v43 }
 0x56d   : > { %1802 = vmatprep.mubr.f32.mxu0 %v3158_v16  ;;  %1873 = vmatprep.mubr.f32.mxu1 %v3158_v16 }
 0x56f   : > { %2643 = vmatpush1.bf16.msra.mxu0 %v3383_v44  ;;  %2675 = vmatpush1.bf16.msra.mxu1 %v3393_v47 }
 0x570   : > { %2645 = vmatprep.subr.bf16.mxu0 %v3406_v51  ;;  %2677 = vmatprep.subr.bf16.mxu1 %v3420_v56 }
 0x573   : > { %2647 = vmatpush1.bf16.msra.mxu0 %v3430_v59  ;;  %2679 = vmatpush1.bf16.msra.mxu1 %v3443_v63 }
 0x574   : > { %2649 = vmatprep.subr.bf16.mxu0 %v3456_v3  ;;  %2681 = vmatprep.subr.bf16.mxu1 %v3466_v6 }
 0x577   : > { %2651 = vmatpush1.bf16.msra.mxu0 %v3477_v10  ;;  %2683 = vmatpush1.bf16.msra.mxu1 %v3487_v13 }
 0x578   : > { %2653 = vmatprep.subr.bf16.mxu0 %v3497_v17  ;;  %2685 = vmatprep.subr.bf16.mxu1 %v3507_v20 }
 0x57b   : > { %2655 = vmatpush1.bf16.msra.mxu0 %v3518_v24  ;;  %2687 = vmatpush1.bf16.msra.mxu1 %v3528_v28 }
 0x57c   : > { %2657 = vmatprep.subr.bf16.mxu0 %v3538_v33  ;;  %2689 = vmatprep.subr.bf16.mxu1 %v3548_v37 }
 0x57f   : > { %2659 = vmatpush1.bf16.msra.mxu0 %v3559_v42  ;;  %2691 = vmatpush1.bf16.msra.mxu1 %v3569_v48 }
 0x580   : > { %2661 = vmatprep.subr.bf16.mxu0 %v3579_v52  ;;  %2693 = vmatprep.subr.bf16.mxu1 %v3589_v55 }
 0x583   : > { %2663 = vmatpush1.bf16.msra.mxu0 %v3600_v61  ;;  %2695 = vmatpush1.bf16.msra.mxu1 %v3610_v1 }
 0x584   : > { %2665 = vmatprep.subr.bf16.mxu0 %v3620_v5  ;;  %2697 = vmatprep.subr.bf16.mxu1 %v3630_v9 }
 0x587   : > { %2667 = vmatpush1.bf16.msra.mxu0 %v3635_v12  ;;  %2699 = vmatpush1.bf16.msra.mxu1 %v3639_v14 }
 0x588   : > { %2701 = vmatprep.subr.bf16.mxu0 %v3332_v26  ;;  %2733 = vmatprep.subr.bf16.mxu1 %v3343_v30 }
 0x63d   : > { %v1627_v18 = vpop.f32.mrb[10].mxu0  ;;  %v1698_v19 = vpop.f32.mrb[10].mxu1 }
 0x63e   : > { %v2774_v21 = vadd.f32 %v1627_v18, %v3689_v25  ;;  %v1629_v22 = vpop.f32.mrb[11].mxu0  ;;  %v1700_v35 = vpop.f32.mrb[11].mxu1  ;;  %v2790_v46 = vadd.f32 %v1698_v19, %v3698_v54 }
 0x63f   : > { %v2775_v36 = vadd.f32 %v1629_v22, %v3691_v27  ;;  %v2791_v41 = vadd.f32 %v1700_v35, %v3695_v49 }
 0x640   : > { %v2230_v39 = vmul.f32 -1.442695, %v2774_v21 }
 0x641   : > { %v2231_v40 = vmul.f32 -1.442695, %v2775_v36  ;;  %v2232_v45 = vmul.f32 -1.442695, %v2791_v41 }
 0x642   : > { %2997 = vpow2.f32 %v2230_v39 }
 0x643   : > { %2999 = vpow2.f32 %v2231_v40 }
 0x644   : > { %3001 = vpow2.f32 %v2232_v45 }
 0x645   : > { %3003 = vtanh.f32 %v2790_v46 }
 0x64c   : > { %v2998_v26 = vpop.eup %2997 }
 0x64d   : > { %v3000_v50 = vpop.eup %2999  ;;  %v1710_v30 = vadd.f32 1.0, %v2998_v26 }
 0x64e   : > { %v1716_v53 = vadd.f32 1.0, %v3000_v50  ;;  %v3002_v57 = vpop.eup %3001 }
 0x64f   : > { %3005 = vrcp.f32 %v1710_v30  ;;  %v3004_v58 = vpop.eup %3003  ;;  %v1723_v2 = vadd.f32 1.0, %v3002_v57 }
 0x650   : > { %3007 = vrcp.f32 %v1716_v53 }
 0x651   : > { %3009 = vrcp.f32 %v1723_v2 }
 0x659   : > { %v3006_v60 = vpop.eup %3005 }
 0x65a   : > { %v3008_v62 = vpop.eup %3007  ;;  %v1727_v0 = vmul.f32 %v3006_v60, %v3004_v58 }
 0x65b   : > { %v1726_v4 = vmul.f32 %v3008_v62, %v3869_v15  ;;  %v3010_v8 = vpop.eup %3009 }
 0x65d   : > { %v3911_v7 = vadd.f32 %v1727_v0, %v1726_v4 }
 0x65f   : > { %3011 = vtanh.f32 %v3911_v7 }
 0x669   : > { %v3012_v11 = vpop.eup %3011 }
 0x66a   : > { %v1730_v23 = vmul.f32 %v3012_v11, %v3010_v8 }
 0x66c   : > { %1803 = vmatmul.mubr.f32.vlgmr.msra.gmra.mrb[12].mxu0 %v1730_v23  ;;  %1874 = vmatmul.mubr.f32.vlgmr.msra.gmra.mrb[12].mxu1 %v1730_v23 }
 0x66d   : > { %2703 = vmatpush1.bf16.msra.mxu0 %v3345_v31  ;;  %2735 = vmatpush1.bf16.msra.mxu1 %v3354_v34 }
 0x66e   : > { %2705 = vmatprep.subr.bf16.mxu0 %v3367_v38  ;;  %2737 = vmatprep.subr.bf16.mxu1 %v3381_v43 }
 0x66f   : > { %1979 = vmatprep.mubr.f32.mxu0 %v3158_v16  ;;  %2050 = vmatprep.mubr.f32.mxu1 %v3158_v16 }
 0x671   : > { %2707 = vmatpush1.bf16.msra.mxu0 %v3383_v44  ;;  %2739 = vmatpush1.bf16.msra.mxu1 %v3393_v47 }
 0x672   : > { %2709 = vmatprep.subr.bf16.mxu0 %v3406_v51  ;;  %2741 = vmatprep.subr.bf16.mxu1 %v3420_v56 }
 0x675   : > { %2711 = vmatpush1.bf16.msra.mxu0 %v3430_v59  ;;  %2743 = vmatpush1.bf16.msra.mxu1 %v3443_v63 }
 0x676   : > { %2713 = vmatprep.subr.bf16.mxu0 %v3456_v3  ;;  %2745 = vmatprep.subr.bf16.mxu1 %v3466_v6 }
 0x679   : > { %2715 = vmatpush1.bf16.msra.mxu0 %v3477_v10  ;;  %2747 = vmatpush1.bf16.msra.mxu1 %v3487_v13 }
 0x67a   : > { %2717 = vmatprep.subr.bf16.mxu0 %v3497_v17  ;;  %2749 = vmatprep.subr.bf16.mxu1 %v3507_v20 }
 0x67d   : > { %2719 = vmatpush1.bf16.msra.mxu0 %v3518_v24  ;;  %2751 = vmatpush1.bf16.msra.mxu1 %v3528_v28 }
 0x67e   : > { %2721 = vmatprep.subr.bf16.mxu0 %v3538_v33  ;;  %2753 = vmatprep.subr.bf16.mxu1 %v3548_v37 }
 0x681   : > { %2723 = vmatpush1.bf16.msra.mxu0 %v3559_v42  ;;  %2755 = vmatpush1.bf16.msra.mxu1 %v3569_v48 }
 0x682   : > { %2725 = vmatprep.subr.bf16.mxu0 %v3579_v52  ;;  %2757 = vmatprep.subr.bf16.mxu1 %v3589_v55 }
 0x685   : > { %2727 = vmatpush1.bf16.msra.mxu0 %v3600_v61  ;;  %2759 = vmatpush1.bf16.msra.mxu1 %v3610_v1 }
 0x686   : > { %2729 = vmatprep.subr.bf16.mxu0 %v3620_v5  ;;  %2761 = vmatprep.subr.bf16.mxu1 %v3630_v9 }
 0x689   : > { %2731 = vmatpush1.bf16.msra.mxu0 %v3635_v12  ;;  %2763 = vmatpush1.bf16.msra.mxu1 %v3639_v14 }
 0x73f   : > { %v1804_v16 = vpop.f32.mrb[12].mxu0  ;;  %v1875_v31 = vpop.f32.mrb[12].mxu1 }
 0x740   : > { %v2776_v34 = vadd.f32 %v1804_v16, %v3689_v25  ;;  %v1806_v38 = vpop.f32.mrb[13].mxu0  ;;  %v1877_v43 = vpop.f32.mrb[13].mxu1  ;;  %v2792_v63 = vadd.f32 %v1875_v31, %v3698_v54 }
 0x741   : > { %v2777_v44 = vadd.f32 %v1806_v38, %v3691_v27  ;;  %v2793_v56 = vadd.f32 %v1877_v43, %v3695_v49 }
 0x742   : > { %v2233_v47 = vmul.f32 -1.442695, %v2776_v34 }
 0x743   : > { %v2234_v51 = vmul.f32 -1.442695, %v2777_v44  ;;  %v2235_v59 = vmul.f32 -1.442695, %v2793_v56 }
 0x744   : > { %3013 = vpow2.f32 %v2233_v47 }
 0x745   : > { %3015 = vpow2.f32 %v2234_v51 }
 0x746   : > { %3017 = vpow2.f32 %v2235_v59 }
 0x747   : > { %3019 = vtanh.f32 %v2792_v63 }
 0x74e   : > { %v3014_v3 = vpop.eup %3013 }
 0x74f   : > { %v3016_v6 = vpop.eup %3015  ;;  %v1887_v10 = vadd.f32 1.0, %v3014_v3 }
 0x750   : > { %v1893_v13 = vadd.f32 1.0, %v3016_v6  ;;  %v3018_v17 = vpop.eup %3017 }
 0x751   : > { %3021 = vrcp.f32 %v1887_v10  ;;  %v3020_v20 = vpop.eup %3019  ;;  %v1900_v37 = vadd.f32 1.0, %v3018_v17 }
 0x752   : > { %3023 = vrcp.f32 %v1893_v13 }
 0x753   : > { %3025 = vrcp.f32 %v1900_v37 }
 0x75b   : > { %v3022_v24 = vpop.eup %3021 }
 0x75c   : > { %v3024_v28 = vpop.eup %3023  ;;  %v1904_v33 = vmul.f32 %v3022_v24, %v3020_v20 }
 0x75d   : > { %v1903_v42 = vmul.f32 %v3024_v28, %v3911_v7  ;;  %v3026_v52 = vpop.eup %3025 }
 0x75f   : > { %v1905_v48 = vadd.f32 %v1904_v33, %v1903_v42 }
 0x761   : > { %3027 = vtanh.f32 %v1905_v48 }
 0x76b   : > { %v3028_v55 = vpop.eup %3027 }
 0x76c   : > { %v1907_v61 = vmul.f32 %v3028_v55, %v3026_v52 }
 0x76e   : > { %1980 = vmatmul.mubr.f32.vlgmr.msra.gmra.mrb[14].mxu0 %v1907_v61  ;;  %2051 = vmatmul.mubr.f32.vlgmr.msra.gmra.mrb[14].mxu1 %v1907_v61 }
 0x841   : > { %v1981_v1 = vpop.f32.mrb[14].mxu0  ;;  %v2052_v5 = vpop.f32.mrb[14].mxu1 }
 0x842   : > { %v2778_v9 = vadd.f32 %v1981_v1, %v3689_v25  ;;  %v1983_v12 = vpop.f32.mrb[15].mxu0  ;;  %v2054_v14 = vpop.f32.mrb[15].mxu1  ;;  %v2794_v21 = vadd.f32 %v2052_v5, %v3698_v54 }
 0x843   : > { %v2779_v15 = vadd.f32 %v1983_v12, %v3691_v27  ;;  %v2795_v18 = vadd.f32 %v2054_v14, %v3695_v49 }
 0x844   : > { %v2236_v29 = vmul.f32 -1.442695, %v2778_v9 }
 0x845   : > { %v2237_v32 = vmul.f32 -1.442695, %v2779_v15  ;;  %v2238_v19 = vmul.f32 -1.442695, %v2795_v18 }
 0x846   : > { %3029 = vpow2.f32 %v2236_v29 }
 0x847   : > { %3031 = vpow2.f32 %v2237_v32 }
 0x848   : > { %3033 = vpow2.f32 %v2238_v19 }
 0x849   : > { %3035 = vtanh.f32 %v2794_v21 }
 0x850   : > { %v3030_v22 = vpop.eup %3029 }
 0x851   : > { %v3032_v35 = vpop.eup %3031  ;;  %v2064_v36 = vadd.f32 1.0, %v3030_v22 }
 0x852   : > { %v2070_v25 = vadd.f32 1.0, %v3032_v35  ;;  %v3034_v27 = vpop.eup %3033 }
 0x853   : > { %3037 = vrcp.f32 %v2064_v36  ;;  %v3036_v39 = vpop.eup %3035  ;;  %v2077_v49 = vadd.f32 1.0, %v3034_v27 }
 0x854   : > { %3039 = vrcp.f32 %v2070_v25 }
 0x855   : > { %3041 = vrcp.f32 %v2077_v49 }
 0x85d   : > { %v3038_v40 = vpop.eup %3037 }
 0x85e   : > { %v3040_v41 = vpop.eup %3039  ;;  %v2081_v45 = vmul.f32 %v3038_v40, %v3036_v39 }
 0x85f   : > { %v2080_v46 = vmul.f32 %v3040_v41, %v1905_v48  ;;  %v3042_v26 = vpop.eup %3041 }
 0x861   : > { %v2082_v54 = vadd.f32 %v2081_v45, %v2080_v46 }
 0x863   : > { %2086 = vst [vmem:[#allocation4] sm:$0xff] %v2082_v54  ;;  %3043 = vtanh.f32 %v2082_v54 }
 0x86d   : > { %v3044_v50 = vpop.eup %3043 }
 0x86e   : > { %v2084_v30 = vmul.f32 %v3044_v50, %v3042_v26 }
 0x870   : > { %2085 = vst [vmem:[#allocation3] sm:$0xff] %v2084_v30  ;;  %2087 = vst [vmem:[%s4034_s9] sm:$0xff] %v2084_v30 }
 0x871   : > { %3058 = shalt.err (!%p3055_p11)
}
 0x872   : > { %s3059_s25 = scalar_lea.hbm %s3961_s8, 128  ;;  %s3063_s14 = scalar_lea.hbm %s4028_s4, 256 }
 0x873   : > { %p3060_p13 = scmp.ne.s32.totalorder %s3961_s8, %s3059_s25  ;;  %p3064_p2 = scmp.lt.u32.totalorder %s3961_s8, %s4028_s4 }
 0x874   : > { %p3065_p3 = scmp.lt.u32.totalorder %s3063_s14, %s3059_s25  ;;  %p3067_p5 = scmp.lt.u32.totalorder %s3059_s25, %s3961_s8 }
 0x875   : > { %p3061_p0 = pnand %p3060_p13, %p3257_p7 }
 0x876   : > { %p3066_p4 = por %p3065_p3, %p3064_p2 }
 0x877   : > { %p3062_p1 = pneg %p3061_p0 }
 0x878   : > { %p3068_p6 = por %p3067_p5, %p3066_p4 }
 0x87a   : > { %p3069_p8 = pnand %p3068_p6, %p3062_p1 }
 0x87c   : > { %3072 = shalt.err (!%p3069_p8)
}
 0x87d   : > { %2828 = dma.vmem_to_hbm [thread:$0]  (%p3257_p7), %s3963_s30, 128, %s3961_s8, %s2089_s21  }
 0x87e PF: > { %p2834_p9 = scmp.ge.s32.totalorder %s3155_s24, 2  ;;  %s2114_s6 = sand.u32 1, %s3119_s15  }
 0x87f   : > { %s2115_s26 = scalar_lea.sflag [#allocation7], %s2114_s6 }
 0x880   : > { %p2831_p10 = pnand %p2834_p9, %p3265_p12 }
 0x882   : > { %3114 = dma.done.wait (!%p2831_p10), %s2115_s26, 128  }
 0x883   : > { %3116 = vsyncadd (!%p2831_p10), %s2115_s26, 4294967168  ;;  %s17_s24 = sadd.s32 1, %s3155_s24   ;;  %s4036_s15 = smov %s3123_s16 }
 0x884   : > { %p14_p11 = scmp.ge.s32.totalorder %s17_s24, 8   ;;  %s4037_s16 = smov %s3127_s17 }
 0x885   : > { %s4038_s17 = smov %s3270_s11  ;;  %s4039_s18 = smov %s3135_s19 }
 0x886   : > { %s4040_s19 = smov %s3273_s12  ;;  %s4041_s20 = smov %s3147_s22 }
 0x887   : > { %s4042_s21 = smov %s3151_s23  ;;  %s4043_s22 = smov %s4046_s27 }
 0x888   : > { %s4044_s23 = smov %s4050_s28  ;;  %16 = sbr.rel (!%p14_p11) target bundleno = 6 (0x6), region = 126 }
 0x88f   :  { %2120 = vsyncpa [#allocation7], 1 }
 0x890   :  { %2122 = vsyncpa [#allocation7 + $0x1], 1 }

</bundles_post_ra>
